<compile_context>
chip_gen: v6e
topology: v6e:2x2x1
jax: 0.10.0
libtpu: 0.0.40
codegen_flags: <defaults>
</compile_context>

<pallas_src>
import functools
import math

import jax
import jax.numpy as jnp
from jax.experimental import pallas as pl
from jax.experimental.pallas import tpu as pltpu


def mha_kernel(q_ref, k_ref, v_ref,
               wq_ref, bq_ref, wk_ref, bk_ref, wv_ref, bv_ref, wo_ref, bo_ref,
               o_ref, q_scr, k_scr, v_scr, *, num_heads):
    """One (batch b, query-tile qi) grid step.

    q_ref            : (1, TQ,  D)   query tile
    k_ref, v_ref     : (1, SKV, D)   full key / value for this batch element
    wq/wk/wv_ref     : (H, D, d_k)   bf16 per-head input projections
                                     (wq already scaled by 1/sqrt(d_k))
    bq/bk/bv_ref     : (H, 1, d_k)   f32 biases (bq scaled)
    wo_ref           : (H, d_k, D)   bf16 per-head slab of the out projection
    bo_ref           : (1, D)        f32
    o_ref            : (1, TQ, D)
    q_scr            : (H, TQ,  d_k) bf16 VMEM scratch
    k_scr, v_scr     : (H, SKV, d_k) bf16 VMEM scratch (persist across qi)
    """
    f32 = jnp.float32
    bf16 = jnp.bfloat16

    # --- Project K/V once per batch element; reused by every query tile. ----
    @pl.when(pl.program_id(1) == 0)
    def _project_kv():
        kx = k_ref[0].astype(bf16)                       # (SKV, D)
        vx = v_ref[0].astype(bf16)
        for h in range(num_heads):                       # contraction stays at D
            k_scr[h] = (jnp.dot(kx, wk_ref[h], preferred_element_type=f32)
                        + bk_ref[h]).astype(bf16)
            v_scr[h] = (jnp.dot(vx, wv_ref[h], preferred_element_type=f32)
                        + bv_ref[h]).astype(bf16)

    # --- Per-head Q projection for this query tile (scale folded into wq). --
    xq = q_ref[0].astype(bf16)                           # (TQ, D)
    for h in range(num_heads):
        q_scr[h] = (jnp.dot(xq, wq_ref[h], preferred_element_type=f32)
                    + bq_ref[h]).astype(bf16)

    Q = q_scr[...]                                       # (H, TQ,  d_k) bf16
    K = k_scr[...]                                       # (H, SKV, d_k) bf16
    V = v_scr[...]                                       # (H, SKV, d_k) bf16

    # Head-batched attention: H is the batch dim of every dot_general.
    s = jnp.einsum("htd,hsd->hts", Q, K,
                   preferred_element_type=f32)           # (H, TQ, SKV)
    s = s - jnp.max(s, axis=-1, keepdims=True)
    p = jnp.exp(s)
    p = p * pl.reciprocal(jnp.sum(p, axis=-1, keepdims=True), approx=True)

    heads = jnp.einsum("hts,hsd->htd", p.astype(bf16), V,
                       preferred_element_type=f32)       # (H, TQ, d_k)

    # Output projection folded per head, reduced over heads (no concat).
    proj = jnp.einsum("htd,hdo->hto", heads.astype(bf16), wo_ref[...],
                      preferred_element_type=f32)        # (H, TQ, D)
    out = jnp.sum(proj, axis=0) + bo_ref[...]            # (TQ, D)
    o_ref[0] = out.astype(o_ref.dtype)


def prepare_params(params, num_heads):
    """One-time parameter layout prep (NOT in the per-call path).

    PyTorch Linear weights are (out_features, in_features); transpose once,
    split per head, fold the 1/sqrt(d_k) softmax scale into wq/bq, and cast
    matmul operands to bf16.
    """
    D = params["wq"].shape[0]
    d_k = D // num_heads
    scale = 1.0 / math.sqrt(d_k)

    def per_head_w(w, s=1.0):
        wt = jnp.asarray(w, jnp.float32).T * s                       # (D_in, D_out)
        return wt.reshape(D, num_heads, d_k).transpose(1, 0, 2).astype(jnp.bfloat16)

    def per_head_b(b, s=1.0):
        return (jnp.asarray(b, jnp.float32) * s).reshape(num_heads, 1, d_k)

    wo_t = jnp.asarray(params["wo"], jnp.float32).T                  # (D_in, D_out)
    return {
        "wq": per_head_w(params["wq"], scale),
        "bq": per_head_b(params["bq"], scale),
        "wk": per_head_w(params["wk"]),
        "bk": per_head_b(params["bk"]),
        "wv": per_head_w(params["wv"]),
        "bv": per_head_b(params["bv"]),
        "wo": wo_t.reshape(num_heads, d_k, D).astype(jnp.bfloat16),  # (H, d_k, D)
        "bo": jnp.asarray(params["bo"], jnp.float32).reshape(1, D),
    }


def _vmem_limit_bytes():
    """Per-generation VMEM budget: ~3/4 of physical, capped at 100 MiB."""
    try:
        info = pltpu.get_tpu_info()
        cap = int(getattr(info, "vmem_capacity_bytes", 128 * 1024 * 1024))
    except Exception:
        cap = 128 * 1024 * 1024
    return min((cap * 3) // 4, 100 * 1024 * 1024)


def multi_head_attention(query, key, value, prep, num_heads, *, block_q=256):
    """prep: output of prepare_params (per-head bf16 weights, scale folded)."""
    B, Sq, D = query.shape
    Skv = key.shape[1]
    assert value.shape[1] == Skv and key.shape[-1] == D and value.shape[-1] == D
    assert D % num_heads == 0, "d_model must divide evenly into heads"
    d_k = D // num_heads
    assert d_k % 8 == 0, "head dim must be a multiple of 8 for TPU layout"

    # Query tile: fill the MXU (>= 128/256 rows) or take the whole sequence.
    if Sq <= block_q or Sq % block_q != 0 or block_q % 8 != 0:
        tq = Sq
    else:
        tq = block_q
    nq = Sq // tq

    q_map = lambda b, qi: (b, qi, 0)
    kv_map = lambda b, qi: (b, 0, 0)
    w_map = lambda b, qi: (0, 0, 0)
    b2_map = lambda b, qi: (0, 0)
    resident = dict(pipeline_mode=pl.Buffered(1))   # constant index: single-buffer

    kernel = functools.partial(mha_kernel, num_heads=num_heads)

    return pl.pallas_call(
        kernel,
        out_shape=jax.ShapeDtypeStruct((B, Sq, D), query.dtype),
        grid=(B, nq),
        in_specs=[
            pl.BlockSpec((1, tq, D), q_map),                          # query tile
            pl.BlockSpec((1, Skv, D), kv_map),                        # key  (full S)
            pl.BlockSpec((1, Skv, D), kv_map),                        # value(full S)
            pl.BlockSpec((num_heads, D, d_k), w_map, **resident),     # wq (scaled)
            pl.BlockSpec((num_heads, 1, d_k), w_map, **resident),     # bq (scaled)
            pl.BlockSpec((num_heads, D, d_k), w_map, **resident),     # wk
            pl.BlockSpec((num_heads, 1, d_k), w_map, **resident),     # bk
            pl.BlockSpec((num_heads, D, d_k), w_map, **resident),     # wv
            pl.BlockSpec((num_heads, 1, d_k), w_map, **resident),     # bv
            pl.BlockSpec((num_heads, d_k, D), w_map, **resident),     # wo
            pl.BlockSpec((1, D), b2_map, **resident),                 # bo
        ],
        out_specs=pl.BlockSpec((1, tq, D), q_map),
        scratch_shapes=[
            pltpu.VMEM((num_heads, tq, d_k), jnp.bfloat16),    # per-head Q tile
            pltpu.VMEM((num_heads, Skv, d_k), jnp.bfloat16),   # projected K (per batch)
            pltpu.VMEM((num_heads, Skv, d_k), jnp.bfloat16),   # projected V (per batch)
        ],
        compiler_params=pltpu.CompilerParams(
            dimension_semantics=("parallel", "arbitrary"),
            vmem_limit_bytes=_vmem_limit_bytes(),
        ),
    )(query, key, value,
      prep["wq"], prep["bq"], prep["wk"], prep["bk"],
      prep["wv"], prep["bv"], prep["wo"], prep["bo"])


def mha_reference(query, key, value, params, num_heads):
    """Pure-JAX f32 reference mirroring the PyTorch MultiHeadAttention forward."""
    B, Sq, D = query.shape
    d_k = D // num_heads
    Q = query @ params["wq"].T + params["bq"]
    K = key @ params["wk"].T + params["bk"]
    V = value @ params["wv"].T + params["bv"]
    Q = Q.reshape(B, Sq, num_heads, d_k).transpose(0, 2, 1, 3)
    K = K.reshape(B, -1, num_heads, d_k).transpose(0, 2, 1, 3)
    V = V.reshape(B, -1, num_heads, d_k).transpose(0, 2, 1, 3)
    scores = jnp.einsum("bhqd,bhkd->bhqk", Q, K) / math.sqrt(d_k)
    probs = jax.nn.softmax(scores, axis=-1)
    out = jnp.einsum("bhqk,bhkd->bhqd", probs, V)
    out = out.transpose(0, 2, 1, 3).reshape(B, Sq, D)
    return out @ params["wo"].T + params["bo"]


if __name__ == "__main__":
    # D = 128 keeps every output store lane-dense; d_k = 32 (multiple of 8).
    B, S, D, H = 2, 32, 128, 4

    root = jax.random.PRNGKey(0)
    ks = jax.random.split(root, 11)
    init = 1.0 / math.sqrt(D)
    params = {
        "wq": jax.random.uniform(ks[0], (D, D), jnp.float32, -init, init),
        "bq": jax.random.uniform(ks[1], (D,), jnp.float32, -init, init),
        "wk": jax.random.uniform(ks[2], (D, D), jnp.float32, -init, init),
        "bk": jax.random.uniform(ks[3], (D,), jnp.float32, -init, init),
        "wv": jax.random.uniform(ks[4], (D, D), jnp.float32, -init, init),
        "bv": jax.random.uniform(ks[5], (D,), jnp.float32, -init, init),
        "wo": jax.random.uniform(ks[6], (D, D), jnp.float32, -init, init),
        "bo": jax.random.uniform(ks[7], (D,), jnp.float32, -init, init),
    }
    query = jax.random.normal(ks[8], (B, S, D), jnp.float32)
    key_in = jax.random.normal(ks[9], (B, S, D), jnp.float32)
    value = jax.random.normal(ks[10], (B, S, D), jnp.float32)

    prep = prepare_params(params, H)                     # one-time layout prep
    ref = mha_reference(query, key_in, value, params, H)

    # Config 1: whole sequence as one query tile (nq = 1), review-recommended
    # for short sequences.
    out1 = jax.block_until_ready(
        multi_head_attention(query, key_in, value, prep, H))
    # Config 2: two query tiles per batch element - exercises the "arbitrary"
    # qi axis and the project-K/V-once VMEM-scratch reuse path.
    out2 = jax.block_until_ready(
        multi_head_attention(query, key_in, value, prep, H, block_q=16))

    assert out1.shape == (B, S, D) and out2.shape == (B, S, D)
    # Tolerance accounts for bf16 MXU operands (f32 accumulation) and the
    # approx (EUP) reciprocal in the softmax denominator.
    assert jnp.allclose(out1, ref, atol=3e-2, rtol=3e-2), "nq=1 mismatch vs reference"
    assert jnp.allclose(out2, ref, atol=3e-2, rtol=3e-2), "nq=2 mismatch vs reference"

    print("KERNEL_OK")
</pallas_src>

<mosaic_0001>
module attributes {stable_mosaic.version = 11 : i64} {
  func.func @mha_kernel(%arg0: i32, %arg1: i32, %arg2: memref<1x32x128xf32, #tpu.memory_space<vmem>>, %arg3: memref<1x32x128xf32, #tpu.memory_space<vmem>>, %arg4: memref<1x32x128xf32, #tpu.memory_space<vmem>>, %arg5: memref<4x128x32xbf16, #tpu.memory_space<vmem>>, %arg6: memref<4x1x32xf32, #tpu.memory_space<vmem>>, %arg7: memref<4x128x32xbf16, #tpu.memory_space<vmem>>, %arg8: memref<4x1x32xf32, #tpu.memory_space<vmem>>, %arg9: memref<4x128x32xbf16, #tpu.memory_space<vmem>>, %arg10: memref<4x1x32xf32, #tpu.memory_space<vmem>>, %arg11: memref<4x32x128xbf16, #tpu.memory_space<vmem>>, %arg12: memref<1x128xf32, #tpu.memory_space<vmem>>, %arg13: memref<1x32x128xf32, #tpu.memory_space<vmem>>, %arg14: memref<4x32x32xbf16, #tpu.memory_space<vmem>>, %arg15: memref<4x32x32xbf16, #tpu.memory_space<vmem>>, %arg16: memref<4x32x32xbf16, #tpu.memory_space<vmem>>) attributes {dimension_semantics = [#tpu.dimension_semantics<parallel>, #tpu.dimension_semantics<arbitrary>], iteration_bounds = array<i64: 2, 1>, scalar_prefetch = 0 : i64, scratch_operands = 3 : i64, tpu.core_type = #tpu.core_type<tc>, window_params = [{transform_indices = @transform_0, window_bounds = array<i64: 1, 32, 128>}, {transform_indices = @transform_1, window_bounds = array<i64: 1, 32, 128>}, {transform_indices = @transform_2, window_bounds = array<i64: 1, 32, 128>}, {pipeline_mode = #tpu.pipeline_mode<synchronous>, transform_indices = @transform_3, window_bounds = array<i64: 4, 128, 32>}, {pipeline_mode = #tpu.pipeline_mode<synchronous>, transform_indices = @transform_4, window_bounds = array<i64: 4, 1, 32>}, {pipeline_mode = #tpu.pipeline_mode<synchronous>, transform_indices = @transform_5, window_bounds = array<i64: 4, 128, 32>}, {pipeline_mode = #tpu.pipeline_mode<synchronous>, transform_indices = @transform_6, window_bounds = array<i64: 4, 1, 32>}, {pipeline_mode = #tpu.pipeline_mode<synchronous>, transform_indices = @transform_7, window_bounds = array<i64: 4, 128, 32>}, {pipeline_mode = #tpu.pipeline_mode<synchronous>, transform_indices = @transform_8, window_bounds = array<i64: 4, 1, 32>}, {pipeline_mode = #tpu.pipeline_mode<synchronous>, transform_indices = @transform_9, window_bounds = array<i64: 4, 32, 128>}, {pipeline_mode = #tpu.pipeline_mode<synchronous>, transform_indices = @transform_10, window_bounds = array<i64: 1, 128>}, {transform_indices = @transform_11, window_bounds = array<i64: 1, 32, 128>}]} {
    %c0_i32 = arith.constant 0 : i32
    %0 = arith.cmpi eq, %arg1, %c0_i32 : i32
    %1 = arith.extui %0 : i1 to i32
    %c0_i32_0 = arith.constant 0 : i32
    %2 = arith.cmpi ne, %1, %c0_i32_0 : i32
    scf.if %2 {
      %c0_62 = arith.constant 0 : index
      %c0_63 = arith.constant 0 : index
      %c0_64 = arith.constant 0 : index
      %76 = vector.load %arg3[%c0_62, %c0_63, %c0_64] : memref<1x32x128xf32, #tpu.memory_space<vmem>>, vector<1x32x128xf32>
      %77 = vector.shape_cast %76 : vector<1x32x128xf32> to vector<32x128xf32>
      %78 = arith.truncf %77 : vector<32x128xf32> to vector<32x128xbf16>
      %c0_65 = arith.constant 0 : index
      %c0_66 = arith.constant 0 : index
      %c0_67 = arith.constant 0 : index
      %79 = vector.load %arg4[%c0_65, %c0_66, %c0_67] : memref<1x32x128xf32, #tpu.memory_space<vmem>>, vector<1x32x128xf32>
      %80 = vector.shape_cast %79 : vector<1x32x128xf32> to vector<32x128xf32>
      %81 = arith.truncf %80 : vector<32x128xf32> to vector<32x128xbf16>
      %c0_68 = arith.constant 0 : index
      %c0_69 = arith.constant 0 : index
      %c0_70 = arith.constant 0 : index
      %82 = vector.load %arg7[%c0_68, %c0_69, %c0_70] : memref<4x128x32xbf16, #tpu.memory_space<vmem>>, vector<1x128x32xbf16>
      %83 = vector.shape_cast %82 : vector<1x128x32xbf16> to vector<128x32xbf16>
      %cst_71 = arith.constant dense<0.000000e+00> : vector<32x32xf32>
      %84 = tpu.matmul %78, %83, %cst_71 {dimension_numbers = #tpu.dot_dimension_numbers<[1], [0], [0], [1], [0, 0, 1, 1], [], []>} : vector<32x128xbf16>, vector<128x32xbf16>, vector<32x32xf32> -> vector<32x32xf32>
      %c0_72 = arith.constant 0 : index
      %c0_73 = arith.constant 0 : index
      %c0_74 = arith.constant 0 : index
      %85 = vector.load %arg8[%c0_72, %c0_73, %c0_74] : memref<4x1x32xf32, #tpu.memory_space<vmem>>, vector<1x1x32xf32>
      %86 = vector.shape_cast %85 : vector<1x1x32xf32> to vector<1x32xf32>
      %87 = vector.broadcast %86 : vector<1x32xf32> to vector<32x32xf32>
      %88 = arith.addf %84, %87 : vector<32x32xf32>
      %89 = arith.truncf %88 : vector<32x32xf32> to vector<32x32xbf16>
      %c0_75 = arith.constant 0 : index
      %c0_76 = arith.constant 0 : index
      %c0_77 = arith.constant 0 : index
      %90 = vector.load %arg15[%c0_75, %c0_76, %c0_77] : memref<4x32x32xbf16, #tpu.memory_space<vmem>>, vector<1x32x32xbf16>
      %91 = vector.shape_cast %90 : vector<1x32x32xbf16> to vector<32x32xbf16>
      %92 = vector.shape_cast %89 : vector<32x32xbf16> to vector<1x32x32xbf16>
      tpu.vector_store %arg15[%c0_75, %c0_76, %c0_77], %92 {strides = array<i32>} : memref<4x32x32xbf16, #tpu.memory_space<vmem>>, vector<1x32x32xbf16>,
      %c0_78 = arith.constant 0 : index
      %c0_79 = arith.constant 0 : index
      %c0_80 = arith.constant 0 : index
      %93 = vector.load %arg9[%c0_78, %c0_79, %c0_80] : memref<4x128x32xbf16, #tpu.memory_space<vmem>>, vector<1x128x32xbf16>
      %94 = vector.shape_cast %93 : vector<1x128x32xbf16> to vector<128x32xbf16>
      %cst_81 = arith.constant dense<0.000000e+00> : vector<32x32xf32>
      %95 = tpu.matmul %81, %94, %cst_81 {dimension_numbers = #tpu.dot_dimension_numbers<[1], [0], [0], [1], [0, 0, 1, 1], [], []>} : vector<32x128xbf16>, vector<128x32xbf16>, vector<32x32xf32> -> vector<32x32xf32>
      %c0_82 = arith.constant 0 : index
      %c0_83 = arith.constant 0 : index
      %c0_84 = arith.constant 0 : index
      %96 = vector.load %arg10[%c0_82, %c0_83, %c0_84] : memref<4x1x32xf32, #tpu.memory_space<vmem>>, vector<1x1x32xf32>
      %97 = vector.shape_cast %96 : vector<1x1x32xf32> to vector<1x32xf32>
      %98 = vector.broadcast %97 : vector<1x32xf32> to vector<32x32xf32>
      %99 = arith.addf %95, %98 : vector<32x32xf32>
      %100 = arith.truncf %99 : vector<32x32xf32> to vector<32x32xbf16>
      %c0_85 = arith.constant 0 : index
      %c0_86 = arith.constant 0 : index
      %c0_87 = arith.constant 0 : index
      %101 = vector.load %arg16[%c0_85, %c0_86, %c0_87] : memref<4x32x32xbf16, #tpu.memory_space<vmem>>, vector<1x32x32xbf16>
      %102 = vector.shape_cast %101 : vector<1x32x32xbf16> to vector<32x32xbf16>
      %103 = vector.shape_cast %100 : vector<32x32xbf16> to vector<1x32x32xbf16>
      tpu.vector_store %arg16[%c0_85, %c0_86, %c0_87], %103 {strides = array<i32>} : memref<4x32x32xbf16, #tpu.memory_space<vmem>>, vector<1x32x32xbf16>,
      %c1_88 = arith.constant 1 : index
      %c0_89 = arith.constant 0 : index
      %c0_90 = arith.constant 0 : index
      %104 = vector.load %arg7[%c1_88, %c0_89, %c0_90] : memref<4x128x32xbf16, #tpu.memory_space<vmem>>, vector<1x128x32xbf16>
      %105 = vector.shape_cast %104 : vector<1x128x32xbf16> to vector<128x32xbf16>
      %cst_91 = arith.constant dense<0.000000e+00> : vector<32x32xf32>
      %106 = tpu.matmul %78, %105, %cst_91 {dimension_numbers = #tpu.dot_dimension_numbers<[1], [0], [0], [1], [0, 0, 1, 1], [], []>} : vector<32x128xbf16>, vector<128x32xbf16>, vector<32x32xf32> -> vector<32x32xf32>
      %c1_92 = arith.constant 1 : index
      %c0_93 = arith.constant 0 : index
      %c0_94 = arith.constant 0 : index
      %107 = vector.load %arg8[%c1_92, %c0_93, %c0_94] : memref<4x1x32xf32, #tpu.memory_space<vmem>>, vector<1x1x32xf32>
      %108 = vector.shape_cast %107 : vector<1x1x32xf32> to vector<1x32xf32>
      %109 = vector.broadcast %108 : vector<1x32xf32> to vector<32x32xf32>
      %110 = arith.addf %106, %109 : vector<32x32xf32>
      %111 = arith.truncf %110 : vector<32x32xf32> to vector<32x32xbf16>
      %c1_95 = arith.constant 1 : index
      %c0_96 = arith.constant 0 : index
      %c0_97 = arith.constant 0 : index
      %112 = vector.load %arg15[%c1_95, %c0_96, %c0_97] : memref<4x32x32xbf16, #tpu.memory_space<vmem>>, vector<1x32x32xbf16>
      %113 = vector.shape_cast %112 : vector<1x32x32xbf16> to vector<32x32xbf16>
      %114 = vector.shape_cast %111 : vector<32x32xbf16> to vector<1x32x32xbf16>
      tpu.vector_store %arg15[%c1_95, %c0_96, %c0_97], %114 {strides = array<i32>} : memref<4x32x32xbf16, #tpu.memory_space<vmem>>, vector<1x32x32xbf16>,
      %c1_98 = arith.constant 1 : index
      %c0_99 = arith.constant 0 : index
      %c0_100 = arith.constant 0 : index
      %115 = vector.load %arg9[%c1_98, %c0_99, %c0_100] : memref<4x128x32xbf16, #tpu.memory_space<vmem>>, vector<1x128x32xbf16>
      %116 = vector.shape_cast %115 : vector<1x128x32xbf16> to vector<128x32xbf16>
      %cst_101 = arith.constant dense<0.000000e+00> : vector<32x32xf32>
      %117 = tpu.matmul %81, %116, %cst_101 {dimension_numbers = #tpu.dot_dimension_numbers<[1], [0], [0], [1], [0, 0, 1, 1], [], []>} : vector<32x128xbf16>, vector<128x32xbf16>, vector<32x32xf32> -> vector<32x32xf32>
      %c1_102 = arith.constant 1 : index
      %c0_103 = arith.constant 0 : index
      %c0_104 = arith.constant 0 : index
      %118 = vector.load %arg10[%c1_102, %c0_103, %c0_104] : memref<4x1x32xf32, #tpu.memory_space<vmem>>, vector<1x1x32xf32>
      %119 = vector.shape_cast %118 : vector<1x1x32xf32> to vector<1x32xf32>
      %120 = vector.broadcast %119 : vector<1x32xf32> to vector<32x32xf32>
      %121 = arith.addf %117, %120 : vector<32x32xf32>
      %122 = arith.truncf %121 : vector<32x32xf32> to vector<32x32xbf16>
      %c1_105 = arith.constant 1 : index
      %c0_106 = arith.constant 0 : index
      %c0_107 = arith.constant 0 : index
      %123 = vector.load %arg16[%c1_105, %c0_106, %c0_107] : memref<4x32x32xbf16, #tpu.memory_space<vmem>>, vector<1x32x32xbf16>
      %124 = vector.shape_cast %123 : vector<1x32x32xbf16> to vector<32x32xbf16>
      %125 = vector.shape_cast %122 : vector<32x32xbf16> to vector<1x32x32xbf16>
      tpu.vector_store %arg16[%c1_105, %c0_106, %c0_107], %125 {strides = array<i32>} : memref<4x32x32xbf16, #tpu.memory_space<vmem>>, vector<1x32x32xbf16>,
      %c2_108 = arith.constant 2 : index
      %c0_109 = arith.constant 0 : index
      %c0_110 = arith.constant 0 : index
      %126 = vector.load %arg7[%c2_108, %c0_109, %c0_110] : memref<4x128x32xbf16, #tpu.memory_space<vmem>>, vector<1x128x32xbf16>
      %127 = vector.shape_cast %126 : vector<1x128x32xbf16> to vector<128x32xbf16>
      %cst_111 = arith.constant dense<0.000000e+00> : vector<32x32xf32>
      %128 = tpu.matmul %78, %127, %cst_111 {dimension_numbers = #tpu.dot_dimension_numbers<[1], [0], [0], [1], [0, 0, 1, 1], [], []>} : vector<32x128xbf16>, vector<128x32xbf16>, vector<32x32xf32> -> vector<32x32xf32>
      %c2_112 = arith.constant 2 : index
      %c0_113 = arith.constant 0 : index
      %c0_114 = arith.constant 0 : index
      %129 = vector.load %arg8[%c2_112, %c0_113, %c0_114] : memref<4x1x32xf32, #tpu.memory_space<vmem>>, vector<1x1x32xf32>
      %130 = vector.shape_cast %129 : vector<1x1x32xf32> to vector<1x32xf32>
      %131 = vector.broadcast %130 : vector<1x32xf32> to vector<32x32xf32>
      %132 = arith.addf %128, %131 : vector<32x32xf32>
      %133 = arith.truncf %132 : vector<32x32xf32> to vector<32x32xbf16>
      %c2_115 = arith.constant 2 : index
      %c0_116 = arith.constant 0 : index
      %c0_117 = arith.constant 0 : index
      %134 = vector.load %arg15[%c2_115, %c0_116, %c0_117] : memref<4x32x32xbf16, #tpu.memory_space<vmem>>, vector<1x32x32xbf16>
      %135 = vector.shape_cast %134 : vector<1x32x32xbf16> to vector<32x32xbf16>
      %136 = vector.shape_cast %133 : vector<32x32xbf16> to vector<1x32x32xbf16>
      tpu.vector_store %arg15[%c2_115, %c0_116, %c0_117], %136 {strides = array<i32>} : memref<4x32x32xbf16, #tpu.memory_space<vmem>>, vector<1x32x32xbf16>,
      %c2_118 = arith.constant 2 : index
      %c0_119 = arith.constant 0 : index
      %c0_120 = arith.constant 0 : index
      %137 = vector.load %arg9[%c2_118, %c0_119, %c0_120] : memref<4x128x32xbf16, #tpu.memory_space<vmem>>, vector<1x128x32xbf16>
      %138 = vector.shape_cast %137 : vector<1x128x32xbf16> to vector<128x32xbf16>
      %cst_121 = arith.constant dense<0.000000e+00> : vector<32x32xf32>
      %139 = tpu.matmul %81, %138, %cst_121 {dimension_numbers = #tpu.dot_dimension_numbers<[1], [0], [0], [1], [0, 0, 1, 1], [], []>} : vector<32x128xbf16>, vector<128x32xbf16>, vector<32x32xf32> -> vector<32x32xf32>
      %c2_122 = arith.constant 2 : index
      %c0_123 = arith.constant 0 : index
      %c0_124 = arith.constant 0 : index
      %140 = vector.load %arg10[%c2_122, %c0_123, %c0_124] : memref<4x1x32xf32, #tpu.memory_space<vmem>>, vector<1x1x32xf32>
      %141 = vector.shape_cast %140 : vector<1x1x32xf32> to vector<1x32xf32>
      %142 = vector.broadcast %141 : vector<1x32xf32> to vector<32x32xf32>
      %143 = arith.addf %139, %142 : vector<32x32xf32>
      %144 = arith.truncf %143 : vector<32x32xf32> to vector<32x32xbf16>
      %c2_125 = arith.constant 2 : index
      %c0_126 = arith.constant 0 : index
      %c0_127 = arith.constant 0 : index
      %145 = vector.load %arg16[%c2_125, %c0_126, %c0_127] : memref<4x32x32xbf16, #tpu.memory_space<vmem>>, vector<1x32x32xbf16>
      %146 = vector.shape_cast %145 : vector<1x32x32xbf16> to vector<32x32xbf16>
      %147 = vector.shape_cast %144 : vector<32x32xbf16> to vector<1x32x32xbf16>
      tpu.vector_store %arg16[%c2_125, %c0_126, %c0_127], %147 {strides = array<i32>} : memref<4x32x32xbf16, #tpu.memory_space<vmem>>, vector<1x32x32xbf16>,
      %c3_128 = arith.constant 3 : index
      %c0_129 = arith.constant 0 : index
      %c0_130 = arith.constant 0 : index
      %148 = vector.load %arg7[%c3_128, %c0_129, %c0_130] : memref<4x128x32xbf16, #tpu.memory_space<vmem>>, vector<1x128x32xbf16>
      %149 = vector.shape_cast %148 : vector<1x128x32xbf16> to vector<128x32xbf16>
      %cst_131 = arith.constant dense<0.000000e+00> : vector<32x32xf32>
      %150 = tpu.matmul %78, %149, %cst_131 {dimension_numbers = #tpu.dot_dimension_numbers<[1], [0], [0], [1], [0, 0, 1, 1], [], []>} : vector<32x128xbf16>, vector<128x32xbf16>, vector<32x32xf32> -> vector<32x32xf32>
      %c3_132 = arith.constant 3 : index
      %c0_133 = arith.constant 0 : index
      %c0_134 = arith.constant 0 : index
      %151 = vector.load %arg8[%c3_132, %c0_133, %c0_134] : memref<4x1x32xf32, #tpu.memory_space<vmem>>, vector<1x1x32xf32>
      %152 = vector.shape_cast %151 : vector<1x1x32xf32> to vector<1x32xf32>
      %153 = vector.broadcast %152 : vector<1x32xf32> to vector<32x32xf32>
      %154 = arith.addf %150, %153 : vector<32x32xf32>
      %155 = arith.truncf %154 : vector<32x32xf32> to vector<32x32xbf16>
      %c3_135 = arith.constant 3 : index
      %c0_136 = arith.constant 0 : index
      %c0_137 = arith.constant 0 : index
      %156 = vector.load %arg15[%c3_135, %c0_136, %c0_137] : memref<4x32x32xbf16, #tpu.memory_space<vmem>>, vector<1x32x32xbf16>
      %157 = vector.shape_cast %156 : vector<1x32x32xbf16> to vector<32x32xbf16>
      %158 = vector.shape_cast %155 : vector<32x32xbf16> to vector<1x32x32xbf16>
      tpu.vector_store %arg15[%c3_135, %c0_136, %c0_137], %158 {strides = array<i32>} : memref<4x32x32xbf16, #tpu.memory_space<vmem>>, vector<1x32x32xbf16>,
      %c3_138 = arith.constant 3 : index
      %c0_139 = arith.constant 0 : index
      %c0_140 = arith.constant 0 : index
      %159 = vector.load %arg9[%c3_138, %c0_139, %c0_140] : memref<4x128x32xbf16, #tpu.memory_space<vmem>>, vector<1x128x32xbf16>
      %160 = vector.shape_cast %159 : vector<1x128x32xbf16> to vector<128x32xbf16>
      %cst_141 = arith.constant dense<0.000000e+00> : vector<32x32xf32>
      %161 = tpu.matmul %81, %160, %cst_141 {dimension_numbers = #tpu.dot_dimension_numbers<[1], [0], [0], [1], [0, 0, 1, 1], [], []>} : vector<32x128xbf16>, vector<128x32xbf16>, vector<32x32xf32> -> vector<32x32xf32>
      %c3_142 = arith.constant 3 : index
      %c0_143 = arith.constant 0 : index
      %c0_144 = arith.constant 0 : index
      %162 = vector.load %arg10[%c3_142, %c0_143, %c0_144] : memref<4x1x32xf32, #tpu.memory_space<vmem>>, vector<1x1x32xf32>
      %163 = vector.shape_cast %162 : vector<1x1x32xf32> to vector<1x32xf32>
      %164 = vector.broadcast %163 : vector<1x32xf32> to vector<32x32xf32>
      %165 = arith.addf %161, %164 : vector<32x32xf32>
      %166 = arith.truncf %165 : vector<32x32xf32> to vector<32x32xbf16>
      %c3_145 = arith.constant 3 : index
      %c0_146 = arith.constant 0 : index
      %c0_147 = arith.constant 0 : index
      %167 = vector.load %arg16[%c3_145, %c0_146, %c0_147] : memref<4x32x32xbf16, #tpu.memory_space<vmem>>, vector<1x32x32xbf16>
      %168 = vector.shape_cast %167 : vector<1x32x32xbf16> to vector<32x32xbf16>
      %169 = vector.shape_cast %166 : vector<32x32xbf16> to vector<1x32x32xbf16>
      tpu.vector_store %arg16[%c3_145, %c0_146, %c0_147], %169 {strides = array<i32>} : memref<4x32x32xbf16, #tpu.memory_space<vmem>>, vector<1x32x32xbf16>,
    } else {
    }
    %c0 = arith.constant 0 : index
    %c0_1 = arith.constant 0 : index
    %c0_2 = arith.constant 0 : index
    %3 = vector.load %arg2[%c0, %c0_1, %c0_2] : memref<1x32x128xf32, #tpu.memory_space<vmem>>, vector<1x32x128xf32>
    %4 = vector.shape_cast %3 : vector<1x32x128xf32> to vector<32x128xf32>
    %5 = arith.truncf %4 : vector<32x128xf32> to vector<32x128xbf16>
    %c0_3 = arith.constant 0 : index
    %c0_4 = arith.constant 0 : index
    %c0_5 = arith.constant 0 : index
    %6 = vector.load %arg5[%c0_3, %c0_4, %c0_5] : memref<4x128x32xbf16, #tpu.memory_space<vmem>>, vector<1x128x32xbf16>
    %7 = vector.shape_cast %6 : vector<1x128x32xbf16> to vector<128x32xbf16>
    %cst = arith.constant dense<0.000000e+00> : vector<32x32xf32>
    %8 = tpu.matmul %5, %7, %cst {dimension_numbers = #tpu.dot_dimension_numbers<[1], [0], [0], [1], [0, 0, 1, 1], [], []>} : vector<32x128xbf16>, vector<128x32xbf16>, vector<32x32xf32> -> vector<32x32xf32>
    %c0_6 = arith.constant 0 : index
    %c0_7 = arith.constant 0 : index
    %c0_8 = arith.constant 0 : index
    %9 = vector.load %arg6[%c0_6, %c0_7, %c0_8] : memref<4x1x32xf32, #tpu.memory_space<vmem>>, vector<1x1x32xf32>
    %10 = vector.shape_cast %9 : vector<1x1x32xf32> to vector<1x32xf32>
    %11 = vector.broadcast %10 : vector<1x32xf32> to vector<32x32xf32>
    %12 = arith.addf %8, %11 : vector<32x32xf32>
    %13 = arith.truncf %12 : vector<32x32xf32> to vector<32x32xbf16>
    %c0_9 = arith.constant 0 : index
    %c0_10 = arith.constant 0 : index
    %c0_11 = arith.constant 0 : index
    %14 = vector.load %arg14[%c0_9, %c0_10, %c0_11] : memref<4x32x32xbf16, #tpu.memory_space<vmem>>, vector<1x32x32xbf16>
    %15 = vector.shape_cast %14 : vector<1x32x32xbf16> to vector<32x32xbf16>
    %16 = vector.shape_cast %13 : vector<32x32xbf16> to vector<1x32x32xbf16>
    tpu.vector_store %arg14[%c0_9, %c0_10, %c0_11], %16 {strides = array<i32>} : memref<4x32x32xbf16, #tpu.memory_space<vmem>>, vector<1x32x32xbf16>,
    %c1 = arith.constant 1 : index
    %c0_12 = arith.constant 0 : index
    %c0_13 = arith.constant 0 : index
    %17 = vector.load %arg5[%c1, %c0_12, %c0_13] : memref<4x128x32xbf16, #tpu.memory_space<vmem>>, vector<1x128x32xbf16>
    %18 = vector.shape_cast %17 : vector<1x128x32xbf16> to vector<128x32xbf16>
    %cst_14 = arith.constant dense<0.000000e+00> : vector<32x32xf32>
    %19 = tpu.matmul %5, %18, %cst_14 {dimension_numbers = #tpu.dot_dimension_numbers<[1], [0], [0], [1], [0, 0, 1, 1], [], []>} : vector<32x128xbf16>, vector<128x32xbf16>, vector<32x32xf32> -> vector<32x32xf32>
    %c1_15 = arith.constant 1 : index
    %c0_16 = arith.constant 0 : index
    %c0_17 = arith.constant 0 : index
    %20 = vector.load %arg6[%c1_15, %c0_16, %c0_17] : memref<4x1x32xf32, #tpu.memory_space<vmem>>, vector<1x1x32xf32>
    %21 = vector.shape_cast %20 : vector<1x1x32xf32> to vector<1x32xf32>
    %22 = vector.broadcast %21 : vector<1x32xf32> to vector<32x32xf32>
    %23 = arith.addf %19, %22 : vector<32x32xf32>
    %24 = arith.truncf %23 : vector<32x32xf32> to vector<32x32xbf16>
    %c1_18 = arith.constant 1 : index
    %c0_19 = arith.constant 0 : index
    %c0_20 = arith.constant 0 : index
    %25 = vector.load %arg14[%c1_18, %c0_19, %c0_20] : memref<4x32x32xbf16, #tpu.memory_space<vmem>>, vector<1x32x32xbf16>
    %26 = vector.shape_cast %25 : vector<1x32x32xbf16> to vector<32x32xbf16>
    %27 = vector.shape_cast %24 : vector<32x32xbf16> to vector<1x32x32xbf16>
    tpu.vector_store %arg14[%c1_18, %c0_19, %c0_20], %27 {strides = array<i32>} : memref<4x32x32xbf16, #tpu.memory_space<vmem>>, vector<1x32x32xbf16>,
    %c2 = arith.constant 2 : index
    %c0_21 = arith.constant 0 : index
    %c0_22 = arith.constant 0 : index
    %28 = vector.load %arg5[%c2, %c0_21, %c0_22] : memref<4x128x32xbf16, #tpu.memory_space<vmem>>, vector<1x128x32xbf16>
    %29 = vector.shape_cast %28 : vector<1x128x32xbf16> to vector<128x32xbf16>
    %cst_23 = arith.constant dense<0.000000e+00> : vector<32x32xf32>
    %30 = tpu.matmul %5, %29, %cst_23 {dimension_numbers = #tpu.dot_dimension_numbers<[1], [0], [0], [1], [0, 0, 1, 1], [], []>} : vector<32x128xbf16>, vector<128x32xbf16>, vector<32x32xf32> -> vector<32x32xf32>
    %c2_24 = arith.constant 2 : index
    %c0_25 = arith.constant 0 : index
    %c0_26 = arith.constant 0 : index
    %31 = vector.load %arg6[%c2_24, %c0_25, %c0_26] : memref<4x1x32xf32, #tpu.memory_space<vmem>>, vector<1x1x32xf32>
    %32 = vector.shape_cast %31 : vector<1x1x32xf32> to vector<1x32xf32>
    %33 = vector.broadcast %32 : vector<1x32xf32> to vector<32x32xf32>
    %34 = arith.addf %30, %33 : vector<32x32xf32>
    %35 = arith.truncf %34 : vector<32x32xf32> to vector<32x32xbf16>
    %c2_27 = arith.constant 2 : index
    %c0_28 = arith.constant 0 : index
    %c0_29 = arith.constant 0 : index
    %36 = vector.load %arg14[%c2_27, %c0_28, %c0_29] : memref<4x32x32xbf16, #tpu.memory_space<vmem>>, vector<1x32x32xbf16>
    %37 = vector.shape_cast %36 : vector<1x32x32xbf16> to vector<32x32xbf16>
    %38 = vector.shape_cast %35 : vector<32x32xbf16> to vector<1x32x32xbf16>
    tpu.vector_store %arg14[%c2_27, %c0_28, %c0_29], %38 {strides = array<i32>} : memref<4x32x32xbf16, #tpu.memory_space<vmem>>, vector<1x32x32xbf16>,
    %c3 = arith.constant 3 : index
    %c0_30 = arith.constant 0 : index
    %c0_31 = arith.constant 0 : index
    %39 = vector.load %arg5[%c3, %c0_30, %c0_31] : memref<4x128x32xbf16, #tpu.memory_space<vmem>>, vector<1x128x32xbf16>
    %40 = vector.shape_cast %39 : vector<1x128x32xbf16> to vector<128x32xbf16>
    %cst_32 = arith.constant dense<0.000000e+00> : vector<32x32xf32>
    %41 = tpu.matmul %5, %40, %cst_32 {dimension_numbers = #tpu.dot_dimension_numbers<[1], [0], [0], [1], [0, 0, 1, 1], [], []>} : vector<32x128xbf16>, vector<128x32xbf16>, vector<32x32xf32> -> vector<32x32xf32>
    %c3_33 = arith.constant 3 : index
    %c0_34 = arith.constant 0 : index
    %c0_35 = arith.constant 0 : index
    %42 = vector.load %arg6[%c3_33, %c0_34, %c0_35] : memref<4x1x32xf32, #tpu.memory_space<vmem>>, vector<1x1x32xf32>
    %43 = vector.shape_cast %42 : vector<1x1x32xf32> to vector<1x32xf32>
    %44 = vector.broadcast %43 : vector<1x32xf32> to vector<32x32xf32>
    %45 = arith.addf %41, %44 : vector<32x32xf32>
    %46 = arith.truncf %45 : vector<32x32xf32> to vector<32x32xbf16>
    %c3_36 = arith.constant 3 : index
    %c0_37 = arith.constant 0 : index
    %c0_38 = arith.constant 0 : index
    %47 = vector.load %arg14[%c3_36, %c0_37, %c0_38] : memref<4x32x32xbf16, #tpu.memory_space<vmem>>, vector<1x32x32xbf16>
    %48 = vector.shape_cast %47 : vector<1x32x32xbf16> to vector<32x32xbf16>
    %49 = vector.shape_cast %46 : vector<32x32xbf16> to vector<1x32x32xbf16>
    tpu.vector_store %arg14[%c3_36, %c0_37, %c0_38], %49 {strides = array<i32>} : memref<4x32x32xbf16, #tpu.memory_space<vmem>>, vector<1x32x32xbf16>,
    %c0_39 = arith.constant 0 : index
    %c0_40 = arith.constant 0 : index
    %c0_41 = arith.constant 0 : index
    %50 = vector.load %arg14[%c0_39, %c0_40, %c0_41] : memref<4x32x32xbf16, #tpu.memory_space<vmem>>, vector<4x32x32xbf16>
    %c0_42 = arith.constant 0 : index
    %c0_43 = arith.constant 0 : index
    %c0_44 = arith.constant 0 : index
    %51 = vector.load %arg15[%c0_42, %c0_43, %c0_44] : memref<4x32x32xbf16, #tpu.memory_space<vmem>>, vector<4x32x32xbf16>
    %c0_45 = arith.constant 0 : index
    %c0_46 = arith.constant 0 : index
    %c0_47 = arith.constant 0 : index
    %52 = vector.load %arg16[%c0_45, %c0_46, %c0_47] : memref<4x32x32xbf16, #tpu.memory_space<vmem>>, vector<4x32x32xbf16>
    "tpu.trace_start"() <{level = 10 : i32, message = "htd,hsd->hts"}> : () -> ()
    %cst_48 = arith.constant dense<0.000000e+00> : vector<4x32x32xf32>
    %53 = tpu.matmul %50, %51, %cst_48 {dimension_numbers = #tpu.dot_dimension_numbers<[2], [2], [1], [1], [0, 0, 0, 1, 1, 1], [0], [0]>} : vector<4x32x32xbf16>, vector<4x32x32xbf16>, vector<4x32x32xf32> -> vector<4x32x32xf32>
    "tpu.trace_stop"() : () -> ()
    %cst_49 = arith.constant dense<0xFF800000> : vector<4x32xf32>
    %54 = vector.multi_reduction <maximumf>, %53, %cst_49 [2] : vector<4x32x32xf32> to vector<4x32xf32>
    %55 = vector.shape_cast %54 : vector<4x32xf32> to vector<4x32x1xf32>
    %56 = vector.broadcast %55 : vector<4x32x1xf32> to vector<4x32x32xf32>
    %57 = arith.subf %53, %56 : vector<4x32x32xf32>
    %58 = math.exp %57 : vector<4x32x32xf32>
    %cst_50 = arith.constant dense<0.000000e+00> : vector<4x32xf32>
    %59 = vector.multi_reduction <add>, %58, %cst_50 [2] : vector<4x32x32xf32> to vector<4x32xf32>
    %60 = vector.shape_cast %59 : vector<4x32xf32> to vector<4x32x1xf32>
    %61 = tpu.reciprocal %60 {approx = true} : vector<4x32x1xf32> -> vector<4x32x1xf32>
    %62 = vector.broadcast %61 : vector<4x32x1xf32> to vector<4x32x32xf32>
    %63 = arith.mulf %58, %62 : vector<4x32x32xf32>
    %64 = arith.truncf %63 : vector<4x32x32xf32> to vector<4x32x32xbf16>
    "tpu.trace_start"() <{level = 10 : i32, message = "hts,hsd->htd"}> : () -> ()
    %cst_51 = arith.constant dense<0.000000e+00> : vector<4x32x32xf32>
    %65 = tpu.matmul %64, %52, %cst_51 {dimension_numbers = #tpu.dot_dimension_numbers<[2], [1], [1], [2], [0, 0, 0, 1, 1, 2], [0], [0]>} : vector<4x32x32xbf16>, vector<4x32x32xbf16>, vector<4x32x32xf32> -> vector<4x32x32xf32>
    "tpu.trace_stop"() : () -> ()
    %66 = arith.truncf %65 : vector<4x32x32xf32> to vector<4x32x32xbf16>
    %c0_52 = arith.constant 0 : index
    %c0_53 = arith.constant 0 : index
    %c0_54 = arith.constant 0 : index
    %67 = vector.load %arg11[%c0_52, %c0_53, %c0_54] : memref<4x32x128xbf16, #tpu.memory_space<vmem>>, vector<4x32x128xbf16>
    "tpu.trace_start"() <{level = 10 : i32, message = "htd,hdo->hto"}> : () -> ()
    %cst_55 = arith.constant dense<0.000000e+00> : vector<4x32x128xf32>
    %68 = tpu.matmul %66, %67, %cst_55 {dimension_numbers = #tpu.dot_dimension_numbers<[2], [1], [1], [2], [0, 0, 0, 1, 1, 2], [0], [0]>} : vector<4x32x32xbf16>, vector<4x32x128xbf16>, vector<4x32x128xf32> -> vector<4x32x128xf32>
    "tpu.trace_stop"() : () -> ()
    %cst_56 = arith.constant dense<0.000000e+00> : vector<32x128xf32>
    %69 = vector.multi_reduction <add>, %68, %cst_56 [0] : vector<4x32x128xf32> to vector<32x128xf32>
    %c0_57 = arith.constant 0 : index
    %c0_58 = arith.constant 0 : index
    %70 = vector.load %arg12[%c0_57, %c0_58] : memref<1x128xf32, #tpu.memory_space<vmem>>, vector<1x128xf32>
    %71 = vector.broadcast %70 : vector<1x128xf32> to vector<32x128xf32>
    %72 = arith.addf %69, %71 : vector<32x128xf32>
    %c0_59 = arith.constant 0 : index
    %c0_60 = arith.constant 0 : index
    %c0_61 = arith.constant 0 : index
    %73 = vector.load %arg13[%c0_59, %c0_60, %c0_61] : memref<1x32x128xf32, #tpu.memory_space<vmem>>, vector<1x32x128xf32>
    %74 = vector.shape_cast %73 : vector<1x32x128xf32> to vector<32x128xf32>
    %75 = vector.shape_cast %72 : vector<32x128xf32> to vector<1x32x128xf32>
    tpu.vector_store %arg13[%c0_59, %c0_60, %c0_61], %75 {strides = array<i32>} : memref<1x32x128xf32, #tpu.memory_space<vmem>>, vector<1x32x128xf32>,
    return
  }
  func.func @transform_0(%arg0: i32, %arg1: i32) -> (i32, i32, i32) {
    %c0_i32 = arith.constant 0 : i32
    %c0_i32_0 = arith.constant 0 : i32
    return %arg0, %arg1, %c0_i32 : i32, i32, i32
  }
  func.func @transform_1(%arg0: i32, %arg1: i32) -> (i32, i32, i32) {
    %c0_i32 = arith.constant 0 : i32
    %c0_i32_0 = arith.constant 0 : i32
    %c0_i32_1 = arith.constant 0 : i32
    return %arg0, %c0_i32, %c0_i32_0 : i32, i32, i32
  }
  func.func @transform_2(%arg0: i32, %arg1: i32) -> (i32, i32, i32) {
    %c0_i32 = arith.constant 0 : i32
    %c0_i32_0 = arith.constant 0 : i32
    %c0_i32_1 = arith.constant 0 : i32
    return %arg0, %c0_i32, %c0_i32_0 : i32, i32, i32
  }
  func.func @transform_3(%arg0: i32, %arg1: i32) -> (i32, i32, i32) {
    %c0_i32 = arith.constant 0 : i32
    %c0_i32_0 = arith.constant 0 : i32
    %c0_i32_1 = arith.constant 0 : i32
    %c0_i32_2 = arith.constant 0 : i32
    return %c0_i32, %c0_i32_0, %c0_i32_1 : i32, i32, i32
  }
  func.func @transform_4(%arg0: i32, %arg1: i32) -> (i32, i32, i32) {
    %c0_i32 = arith.constant 0 : i32
    %c0_i32_0 = arith.constant 0 : i32
    %c0_i32_1 = arith.constant 0 : i32
    %c0_i32_2 = arith.constant 0 : i32
    return %c0_i32, %c0_i32_0, %c0_i32_1 : i32, i32, i32
  }
  func.func @transform_5(%arg0: i32, %arg1: i32) -> (i32, i32, i32) {
    %c0_i32 = arith.constant 0 : i32
    %c0_i32_0 = arith.constant 0 : i32
    %c0_i32_1 = arith.constant 0 : i32
    %c0_i32_2 = arith.constant 0 : i32
    return %c0_i32, %c0_i32_0, %c0_i32_1 : i32, i32, i32
  }
  func.func @transform_6(%arg0: i32, %arg1: i32) -> (i32, i32, i32) {
    %c0_i32 = arith.constant 0 : i32
    %c0_i32_0 = arith.constant 0 : i32
    %c0_i32_1 = arith.constant 0 : i32
    %c0_i32_2 = arith.constant 0 : i32
    return %c0_i32, %c0_i32_0, %c0_i32_1 : i32, i32, i32
  }
  func.func @transform_7(%arg0: i32, %arg1: i32) -> (i32, i32, i32) {
    %c0_i32 = arith.constant 0 : i32
    %c0_i32_0 = arith.constant 0 : i32
    %c0_i32_1 = arith.constant 0 : i32
    %c0_i32_2 = arith.constant 0 : i32
    return %c0_i32, %c0_i32_0, %c0_i32_1 : i32, i32, i32
  }
  func.func @transform_8(%arg0: i32, %arg1: i32) -> (i32, i32, i32) {
    %c0_i32 = arith.constant 0 : i32
    %c0_i32_0 = arith.constant 0 : i32
    %c0_i32_1 = arith.constant 0 : i32
    %c0_i32_2 = arith.constant 0 : i32
    return %c0_i32, %c0_i32_0, %c0_i32_1 : i32, i32, i32
  }
  func.func @transform_9(%arg0: i32, %arg1: i32) -> (i32, i32, i32) {
    %c0_i32 = arith.constant 0 : i32
    %c0_i32_0 = arith.constant 0 : i32
    %c0_i32_1 = arith.constant 0 : i32
    %c0_i32_2 = arith.constant 0 : i32
    return %c0_i32, %c0_i32_0, %c0_i32_1 : i32, i32, i32
  }
  func.func @transform_10(%arg0: i32, %arg1: i32) -> (i32, i32) {
    %c0_i32 = arith.constant 0 : i32
    %c0_i32_0 = arith.constant 0 : i32
    %c0_i32_1 = arith.constant 0 : i32
    return %c0_i32, %c0_i32_0 : i32, i32
  }
  func.func @transform_11(%arg0: i32, %arg1: i32) -> (i32, i32, i32) {
    %c0_i32 = arith.constant 0 : i32
    %c0_i32_0 = arith.constant 0 : i32
    return %arg0, %arg1, %c0_i32 : i32, i32, i32
  }
}

</mosaic_0001>

<bundles_post_ra>
// kernel: tpu_custom_call.1
= control target key start
LH: loop header
LB: loop body
LE: loop exit
PB: predicated region body
PF: predicated region fallthrough
CT: control target
= control target key end

     0   :  { %16 = vsyncpa [#allocation6], 0  ;;  %s5538_s0 = inlined_call_operand.vmem [shape: f32[2,32,128], index: 0, kind: input, shape index: {}]   ;;  %s5539_s1 = inlined_call_operand.vmem [shape: f32[2,32,128], index: 1, kind: input, shape index: {}]   ;;  %s5540_s2 = inlined_call_operand.vmem [shape: f32[2,32,128], index: 2, kind: input, shape index: {}]   ;;  %s5541_s3 = inlined_call_operand.vmem [shape: bf16[4,128,32], index: 3, kind: input, shape index: {}]   ;;  %s5542_s4 = inlined_call_operand.vmem [shape: f32[4,1,32], index: 4, kind: input, shape index: {}]   ;;  %s5543_s5 = inlined_call_operand.vmem [shape: bf16[4,128,32], index: 5, kind: input, shape index: {}]   ;;  %s5544_s6 = inlined_call_operand.vmem [shape: f32[4,1,32], index: 6, kind: input, shape index: {}]   ;;  %s5545_s7 = inlined_call_operand.vmem [shape: bf16[4,128,32], index: 7, kind: input, shape index: {}]   ;;  %s5546_s8 = inlined_call_operand.vmem [shape: f32[4,1,32], index: 8, kind: input, shape index: {}]   ;;  %s5547_s9 = inlined_call_operand.vmem [shape: bf16[4,32,128], index: 9, kind: input, shape index: {}]   ;;  %s5548_s10 = inlined_call_operand.vmem [shape: f32[1,128], index: 10, kind: input, shape index: {}]   ;;  %s5549_s11 = inlined_call_operand.hbm [shape: f32[2,32,128], index: 11, kind: output, shape index: {}]  }
   0x1   :  { %18 = vsyncpa [#allocation6 + $0x1], 0  ;;  %s4788_s17 = smov 0   ;;  %s4790_s18 = smov 0  }
   0x2   :  { %s4792_s19 = smov 0   ;;  %s4794_s20 = smov 0  }
   0x3   :  { %s4796_s21 = smov 0   ;;  %s4798_s22 = smov 0  }
   0x4 LB: > { %5552 = sst [smem:[#allocation8_spill]] %s4719_s21  ;;  %s3451_s23 = sadd.s32 4294967295, %s4723_s22   ;;  %s4723_s22 = sphi %s4798_s22, %s24_s22   ;;  %s4719_s21 = sphi %s4796_s21, %s5557_s21   ;;  %s4715_s20 = sphi %s4794_s20, %s5556_s20   ;;  %s4711_s19 = sphi %s4792_s19, %s5560_s19   ;;  %s4707_s18 = sphi %s4790_s18, %s5559_s18   ;;  %s4703_s17 = sphi %s4788_s17, %s5558_s17  }
   0x5   : > { %s3452_s24 = sadd.s32 4294967294, %s4723_s22   ;;  %s36_s25 = sadd.s32 1, %s4719_s21 }
   0x6   : > { %s293_s26 = sadd.s32 1, %s4711_s19  ;;  %p38_p0 = scmp.ge.s32.totalorder %s36_s25, 2 }
   0x7   : > { %p303_p1 = scmp.ne.s32.totalorder %s4711_s19, %s4707_s18  ;;  %p304_p2 = scmp.eq.s32.totalorder %s3451_s23, 1 }
   0x8   : > { %p309_p3 = scmp.ne.s32.totalorder %s4707_s18, %s4703_s17  ;;  %s5562_s25 = smov (%p38_p0, %s36_s25), 0 }
   0x9   : > { %5553 = sst [smem:[#allocation9_spill]] %s5562_s25  ;;  %p4828_p4 = por %p304_p2, %p303_p1 }
   0xa   : > { %p310_p5 = scmp.eq.s32.totalorder %s3452_s24, 1  ;;  %s288_s28 = ssub.s32 %s4719_s21, %s5562_s25 }
   0xb   : > { %p3455_p6 = scmp.ge.s32.totalorder %s4723_s22, 1  ;;  %p291_p7 = scmp.eq.s32.totalorder %s288_s28, 0 }
   0xc   : > { %p4835_p8 = por %p310_p5, %p309_p3  ;;  %p381_p9 = scmp.lt.s32.totalorder %s4723_s22, 3 }
   0xd   : > { %s4841_s30 = scalar_select %p291_p7, %s4711_s19, %s293_s26  }
   0xe   : > { %p382_p10 = pnand %p3455_p6, %p381_p9 }
   0xf   : > { %p436_p11 = scmp.lt.s32.totalorder (!%p382_p10), %s4715_s20, 1 }
  0x10   : > { %385 = sbr.rel (%p382_p10) target bundleno = 1369 (0x559), region = 64 }
  0x15   : > { %v4455_v0 = vld [vmem:[%s5543_s5 + $0x38] sm:$0xff]   ;;  %v4457_v2 = vld [vmem:[%s5543_s5 + $0x30] sm:$0xff]   ;;  %v4459_v4 = vld [vmem:[%s5543_s5 + $0x28] sm:$0xff]   ;;  %s437_s15 = scalar_select %p436_p11, %s4715_s20, 1  ;;  %vm609_vm0 = vcmask 257024   ;;  %vm2256_vm1 = vcmask 261120  }
  0x16   : > { %v4456_v1 = vld [vmem:[%s5545_s7 + $0x38] sm:$0xff]   ;;  %4054 = vmatprep.subr.bf16.mxu0 %v4455_v0  ;;  %v4458_v3 = vld [vmem:[%s5545_s7 + $0x30] sm:$0xff]   ;;  %v4460_v5 = vld [vmem:[%s5545_s7 + $0x28] sm:$0xff]  }
  0x17   : > { %4074 = vmatprep.subr.bf16.mxu1 %v4456_v1  ;;  %4055 = vmatpush3.bf16.msra.mxu0 %v4455_v0  ;;  %v4461_v6 = vld [vmem:[%s5543_s5 + $0x20] sm:$0xff]   ;;  %s4869_s28 = sshll.u32 %s437_s15, 5  ;;  %v4463_v8 = vld [vmem:[%s5543_s5 + $0x18] sm:$0xff]   ;;  %v4465_v10 = vld [vmem:[%s5543_s5 + $0x10] sm:$0xff]   ;;  %s3885_s15 = sshll.u32 %s4715_s20, 9 }
  0x18   : > { %4075 = vmatpush3.bf16.msra.mxu1 %v4456_v1  ;;  %4056 = vmatprep.subr.bf16.mxu0 %v4457_v2  ;;  %v4462_v7 = vld [vmem:[%s5545_s7 + $0x20] sm:$0xff]   ;;  %v4464_v9 = vld [vmem:[%s5545_s7 + $0x18] sm:$0xff]   ;;  %s449_s24 = scalar_lea.vmem %s5539_s1, %s4869_s28  ;;  %s4885_s21 = scalar_lea.vmem %s5540_s2, %s4869_s28  ;;  %v4466_v13 = vld [vmem:[%s5545_s7 + $0x10] sm:$0xff]  }
  0x19   : > { %4076 = vmatprep.subr.bf16.mxu1 %v4458_v3  ;;  %v461_v11 = vld [vmem:[%s449_s24] sm:$0xff]  ;;  %v462_v12 = vld [vmem:[%s449_s24 + $0x8] sm:$0xff]  ;;  %v463_v22 = vld [vmem:[%s449_s24 + $0x10] sm:$0xff] }
  0x1a   : > { %v4893_v14 = vpack.c.bf16 %v462_v12, %v461_v11  ;;  %v467_v15 = vld [vmem:[%s4885_s21] sm:$0xff]  ;;  %v468_v16 = vld [vmem:[%s4885_s21 + $0x8] sm:$0xff]  ;;  %v464_v23 = vld [vmem:[%s449_s24 + $0x18] sm:$0xff]  ;;  %s5489_s24 = scalar_lea.hbm %s5549_s11, %s3885_s15 }
  0x1b   : > { %4057 = vmatpush3.bf16.msra.mxu0 %v4457_v2  ;;  %v4897_v17 = vpack.c.bf16 %v468_v16, %v467_v15  ;;  %v4467_v18 = vld [vmem:[%s5543_s5 + $0x8] sm:$0xff]   ;;  %v4469_v20 = vld [vmem:[%s5543_s5] sm:$0xff]   ;;  %v4471_v24 = vld [vmem:[%s5543_s5 + $0x78] sm:$0xff]   ;;  %v4921_v28 = vpack.c.bf16 %v464_v23, %v463_v22 }
  0x1c   : > { %4077 = vmatpush3.bf16.msra.mxu1 %v4458_v3  ;;  %4058 = vmatprep.subr.bf16.mxu0 %v4459_v4  ;;  %v4468_v19 = vld [vmem:[%s5545_s7 + $0x8] sm:$0xff]   ;;  %v4470_v21 = vld [vmem:[%s5545_s7] sm:$0xff]   ;;  %v469_v25 = vld [vmem:[%s4885_s21 + $0x10] sm:$0xff] }
  0x1d   : > { %4078 = vmatprep.subr.bf16.mxu1 %v4460_v5  ;;  %4070 = vmatprep.mubr.bf16.mxu0 %v4893_v14  ;;  %v470_v26 = vld [vmem:[%s4885_s21 + $0x18] sm:$0xff]  ;;  %v4473_v30 = vld [vmem:[%s5543_s5 + $0x70] sm:$0xff]   ;;  %v4475_v32 = vld [vmem:[%s5543_s5 + $0x68] sm:$0xff]   ;;  %s5079_s21 = scalar_lea.vmem %s5538_s0, %s4869_s28 }
  0x1e   : > { %4090 = vmatprep.mubr.bf16.mxu1 %v4897_v17  ;;  %v4472_v27 = vld [vmem:[%s5545_s7 + $0x78] sm:$0xff]   ;;  %v4923_v29 = vpack.c.bf16 %v470_v26, %v469_v25  ;;  %v4474_v31 = vld [vmem:[%s5545_s7 + $0x70] sm:$0xff]   ;;  %v4476_v33 = vld [vmem:[%s5545_s7 + $0x68] sm:$0xff]  }
  0x1f   : > { %4059 = vmatpush3.bf16.msra.mxu0 %v4459_v4  ;;  %v4477_v34 = vld [vmem:[%s5543_s5 + $0x60] sm:$0xff]   ;;  %v4479_v36 = vld [vmem:[%s5543_s5 + $0x58] sm:$0xff]   ;;  %v4481_v38 = vld [vmem:[%s5543_s5 + $0x50] sm:$0xff]  }
  0x20   : > { %4079 = vmatpush3.bf16.msra.mxu1 %v4460_v5  ;;  %4060 = vmatprep.subr.bf16.mxu0 %v4461_v6  ;;  %v4478_v35 = vld [vmem:[%s5545_s7 + $0x60] sm:$0xff]   ;;  %v4480_v37 = vld [vmem:[%s5545_s7 + $0x58] sm:$0xff]   ;;  %v4482_v39 = vld [vmem:[%s5545_s7 + $0x50] sm:$0xff]  }
  0x21   : > { %4080 = vmatprep.subr.bf16.mxu1 %v4462_v7  ;;  %v4483_v40 = vld [vmem:[%s5543_s5 + $0x48] sm:$0xff]   ;;  %v4485_v42 = vld [vmem:[%s5543_s5 + $0x40] sm:$0xff]   ;;  %v4487_v44 = vld [vmem:[%s5543_s5 + $0xb8] sm:$0xff]  }
  0x22   : > { %v4484_v41 = vld [vmem:[%s5545_s7 + $0x48] sm:$0xff]   ;;  %v4486_v43 = vld [vmem:[%s5545_s7 + $0x40] sm:$0xff]   ;;  %v4488_v45 = vld [vmem:[%s5545_s7 + $0xb8] sm:$0xff]  }
  0x23   : > { %4061 = vmatpush3.bf16.msra.mxu0 %v4461_v6  ;;  %v4489_v46 = vld [vmem:[%s5543_s5 + $0xb0] sm:$0xff]   ;;  %v4491_v48 = vld [vmem:[%s5543_s5 + $0xa8] sm:$0xff]   ;;  %v4493_v50 = vld [vmem:[%s5543_s5 + $0xa0] sm:$0xff]  }
  0x24   : > { %4081 = vmatpush3.bf16.msra.mxu1 %v4462_v7  ;;  %4062 = vmatprep.subr.bf16.mxu0 %v4463_v8  ;;  %v4490_v47 = vld [vmem:[%s5545_s7 + $0xb0] sm:$0xff]   ;;  %v4492_v49 = vld [vmem:[%s5545_s7 + $0xa8] sm:$0xff]   ;;  %v4494_v51 = vld [vmem:[%s5545_s7 + $0xa0] sm:$0xff]  }
  0x25   : > { %4082 = vmatprep.subr.bf16.mxu1 %v4464_v9  ;;  %v4495_v52 = vld [vmem:[%s5543_s5 + $0x98] sm:$0xff]   ;;  %v4497_v54 = vld [vmem:[%s5543_s5 + $0x90] sm:$0xff]   ;;  %v4499_v56 = vld [vmem:[%s5543_s5 + $0x88] sm:$0xff]  }
  0x26   : > { %v4496_v53 = vld [vmem:[%s5545_s7 + $0x98] sm:$0xff]   ;;  %v4498_v55 = vld [vmem:[%s5545_s7 + $0x90] sm:$0xff]   ;;  %v4500_v57 = vld [vmem:[%s5545_s7 + $0x88] sm:$0xff]  }
  0x27   : > { %4063 = vmatpush3.bf16.msra.mxu0 %v4463_v8  ;;  %v4501_v58 = vld [vmem:[%s5543_s5 + $0x80] sm:$0xff]   ;;  %v4503_v60 = vld [vmem:[%s5543_s5 + $0xf8] sm:$0xff]   ;;  %v4505_v62 = vld [vmem:[%s5543_s5 + $0xf0] sm:$0xff]  }
  0x28   : > { %4083 = vmatpush3.bf16.msra.mxu1 %v4464_v9  ;;  %4064 = vmatprep.subr.bf16.mxu0 %v4465_v10  ;;  %v4502_v59 = vld [vmem:[%s5545_s7 + $0x80] sm:$0xff]   ;;  %v4504_v61 = vld [vmem:[%s5545_s7 + $0xf8] sm:$0xff]   ;;  %v4506_v63 = vld [vmem:[%s5545_s7 + $0xf0] sm:$0xff]  }
  0x29   : > { %4084 = vmatprep.subr.bf16.mxu1 %v4466_v13  ;;  %v4507_v0 = vld [vmem:[%s5543_s5 + $0xe8] sm:$0xff]   ;;  %v4509_v2 = vld [vmem:[%s5543_s5 + $0xe0] sm:$0xff]   ;;  %v4511_v4 = vld [vmem:[%s5543_s5 + $0xd8] sm:$0xff]  }
  0x2a   : > { %v4508_v1 = vld [vmem:[%s5545_s7 + $0xe8] sm:$0xff]   ;;  %v4510_v3 = vld [vmem:[%s5545_s7 + $0xe0] sm:$0xff]   ;;  %v4512_v5 = vld [vmem:[%s5545_s7 + $0xd8] sm:$0xff]  }
  0x2b   : > { %4065 = vmatpush3.bf16.msra.mxu0 %v4465_v10  ;;  %v4513_v6 = vld [vmem:[%s5543_s5 + $0xd0] sm:$0xff]   ;;  %v4515_v8 = vld [vmem:[%s5543_s5 + $0xc8] sm:$0xff]   ;;  %v4517_v10 = vld [vmem:[%s5543_s5 + $0xc0] sm:$0xff]  }
  0x2c   : > { %4085 = vmatpush3.bf16.msra.mxu1 %v4466_v13  ;;  %4066 = vmatprep.subr.bf16.mxu0 %v4467_v18  ;;  %v4514_v7 = vld [vmem:[%s5545_s7 + $0xd0] sm:$0xff]   ;;  %v4516_v9 = vld [vmem:[%s5545_s7 + $0xc8] sm:$0xff]   ;;  %v4518_v11 = vld [vmem:[%s5545_s7 + $0xc0] sm:$0xff]  }
  0x2d   : > { %4086 = vmatprep.subr.bf16.mxu1 %v4468_v19  ;;  %v4519_v12 = vld [vmem:[%s5541_s3 + $0x38] sm:$0xff]   ;;  %v1613_v15 = vld [vmem:[%s5079_s21 + $0x8] sm:$0xff]  ;;  %v4521_v16 = vld [vmem:[%s5541_s3 + $0x30] sm:$0xff]  }
  0x2e   : > { %v4520_v13 = vld [vmem:[%s5541_s3 + $0x78] sm:$0xff]   ;;  %v4526_v22 = vld [vmem:[%s5541_s3 + $0x60] sm:$0xff]   ;;  %v4529_v25 = vld [vmem:[%s5541_s3 + $0x10] sm:$0xff]  }
  0x2f   : > { %4067 = vmatpush3.bf16.msra.mxu0 %v4467_v18  ;;  %v4527_v23 = vld [vmem:[%s5541_s3 + $0x18] sm:$0xff]   ;;  %v4530_v26 = vld [vmem:[%s5541_s3 + $0x50] sm:$0xff]  }
  0x30   : > { %4087 = vmatpush3.bf16.msra.mxu1 %v4468_v19  ;;  %4068 = vmatprep.subr.bf16.mxu0 %v4469_v20  ;;  %v4523_v19 = vld [vmem:[%s5541_s3 + $0x28] sm:$0xff]  }
  0x31   : > { %4088 = vmatprep.subr.bf16.mxu1 %v4470_v21 }
  0x33   : > { %4069 = vmatpush3.bf16.msra.mxu0 %v4469_v20  ;;  %v4524_v20 = vld [vmem:[%s5541_s3 + $0x68] sm:$0xff]  }
  0x34   : > { %4089 = vmatpush3.bf16.msra.mxu1 %v4470_v21  ;;  %4094 = vmatprep.subr.bf16.mxu0 %v4471_v24  ;;  %v4525_v21 = vld [vmem:[%s5541_s3 + $0x20] sm:$0xff]  }
  0x35   : > { %4114 = vmatprep.subr.bf16.mxu1 %v4472_v27 }
  0x36   : > { %4071 = vmatmul.mubr.bf16.vlgmr.msra.gmra.mxu0 %v4921_v28 }
  0x37   : > { %4091 = vmatmul.mubr.bf16.vlgmr.msra.gmra.mxu1 %v4923_v29  ;;  %4095 = vmatpush3.bf16.msra.mxu0 %v4471_v24  ;;  %v4528_v24 = vld [vmem:[%s5541_s3 + $0x58] sm:$0xff]  }
  0x38   : > { %4115 = vmatpush3.bf16.msra.mxu1 %v4472_v27  ;;  %4096 = vmatprep.subr.bf16.mxu0 %v4473_v30  ;;  %v4531_v27 = vld [vmem:[%s5541_s3 + $0x8] sm:$0xff]  }
  0x39   : > { %4116 = vmatprep.subr.bf16.mxu1 %v4474_v31  ;;  %4110 = vmatprep.mubr.bf16.mxu0 %v4893_v14 }
  0x3a   : > { %4130 = vmatprep.mubr.bf16.mxu1 %v4897_v17 }
  0x3b   : > { %4097 = vmatpush3.bf16.msra.mxu0 %v4473_v30  ;;  %v4534_v30 = vld [vmem:[%s5541_s3 + $0x40] sm:$0xff]  }
  0x3c   : > { %4117 = vmatpush3.bf16.msra.mxu1 %v4474_v31  ;;  %4098 = vmatprep.subr.bf16.mxu0 %v4475_v32  ;;  %v1614_v31 = vld [vmem:[%s5079_s21 + $0x10] sm:$0xff] }
  0x3d   : > { %4118 = vmatprep.subr.bf16.mxu1 %v4476_v33 }
  0x3f   : > { %4099 = vmatpush3.bf16.msra.mxu0 %v4475_v32  ;;  %v1615_v32 = vld [vmem:[%s5079_s21 + $0x18] sm:$0xff] }
  0x40   : > { %4119 = vmatpush3.bf16.msra.mxu1 %v4476_v33  ;;  %4100 = vmatprep.subr.bf16.mxu0 %v4477_v34  ;;  %v4535_v33 = vld [vmem:[%s5541_s3 + $0xb8] sm:$0xff]  }
  0x41   : > { %4120 = vmatprep.subr.bf16.mxu1 %v4478_v35 }
  0x43   : > { %4101 = vmatpush3.bf16.msra.mxu0 %v4477_v34  ;;  %v4536_v34 = vld [vmem:[%s5541_s3 + $0xf8] sm:$0xff]  }
  0x44   : > { %4121 = vmatpush3.bf16.msra.mxu1 %v4478_v35  ;;  %4102 = vmatprep.subr.bf16.mxu0 %v4479_v36  ;;  %v1617_v35 = vpack.c.bf16 %v1615_v32, %v1614_v31 }
  0x45   : > { %4122 = vmatprep.subr.bf16.mxu1 %v4480_v37 }
  0x47   : > { %4103 = vmatpush3.bf16.msra.mxu0 %v4479_v36  ;;  %v4537_v36 = vld [vmem:[%s5541_s3 + $0xb0] sm:$0xff]  }
  0x48   : > { %4123 = vmatpush3.bf16.msra.mxu1 %v4480_v37  ;;  %4104 = vmatprep.subr.bf16.mxu0 %v4481_v38  ;;  %v4538_v37 = vld [vmem:[%s5541_s3 + $0xf0] sm:$0xff]  }
  0x49   : > { %4124 = vmatprep.subr.bf16.mxu1 %v4482_v39 }
  0x4b   : > { %4105 = vmatpush3.bf16.msra.mxu0 %v4481_v38  ;;  %v4539_v38 = vld [vmem:[%s5541_s3 + $0xa8] sm:$0xff]  }
  0x4c   : > { %4125 = vmatpush3.bf16.msra.mxu1 %v4482_v39  ;;  %4106 = vmatprep.subr.bf16.mxu0 %v4483_v40  ;;  %v4540_v39 = vld [vmem:[%s5541_s3 + $0xe8] sm:$0xff]  }
  0x4d   : > { %4126 = vmatprep.subr.bf16.mxu1 %v4484_v41 }
  0x4f   : > { %4107 = vmatpush3.bf16.msra.mxu0 %v4483_v40  ;;  %v4541_v40 = vld [vmem:[%s5541_s3 + $0xa0] sm:$0xff]  }
  0x50   : > { %4127 = vmatpush3.bf16.msra.mxu1 %v4484_v41  ;;  %4108 = vmatprep.subr.bf16.mxu0 %v4485_v42  ;;  %v4542_v41 = vld [vmem:[%s5541_s3 + $0xe0] sm:$0xff]  }
  0x51   : > { %4128 = vmatprep.subr.bf16.mxu1 %v4486_v43 }
  0x53   : > { %4109 = vmatpush3.bf16.msra.mxu0 %v4485_v42  ;;  %v4543_v42 = vld [vmem:[%s5541_s3 + $0x98] sm:$0xff]  }
  0x54   : > { %4129 = vmatpush3.bf16.msra.mxu1 %v4486_v43  ;;  %4134 = vmatprep.subr.bf16.mxu0 %v4487_v44  ;;  %v4544_v43 = vld [vmem:[%s5541_s3 + $0xd8] sm:$0xff]  }
  0x55   : > { %4154 = vmatprep.subr.bf16.mxu1 %v4488_v45 }
  0x56   : > { %4111 = vmatmul.mubr.bf16.vlgmr.msra.gmra.mxu0 %v4921_v28 }
  0x57   : > { %4131 = vmatmul.mubr.bf16.vlgmr.msra.gmra.mxu1 %v4923_v29  ;;  %4135 = vmatpush3.bf16.msra.mxu0 %v4487_v44  ;;  %v4545_v44 = vld [vmem:[%s5541_s3 + $0x90] sm:$0xff]  }
  0x58   : > { %4155 = vmatpush3.bf16.msra.mxu1 %v4488_v45  ;;  %4136 = vmatprep.subr.bf16.mxu0 %v4489_v46  ;;  %v4546_v45 = vld [vmem:[%s5541_s3 + $0xd0] sm:$0xff]  }
  0x59   : > { %4156 = vmatprep.subr.bf16.mxu1 %v4490_v47  ;;  %4150 = vmatprep.mubr.bf16.mxu0 %v4893_v14 }
  0x5a   : > { %4170 = vmatprep.mubr.bf16.mxu1 %v4897_v17 }
  0x5b   : > { %4137 = vmatpush3.bf16.msra.mxu0 %v4489_v46  ;;  %v4547_v46 = vld [vmem:[%s5541_s3 + $0x88] sm:$0xff]  }
  0x5c   : > { %4157 = vmatpush3.bf16.msra.mxu1 %v4490_v47  ;;  %4138 = vmatprep.subr.bf16.mxu0 %v4491_v48  ;;  %v4548_v47 = vld [vmem:[%s5541_s3 + $0xc8] sm:$0xff]  }
  0x5d   : > { %4158 = vmatprep.subr.bf16.mxu1 %v4492_v49 }
  0x5f   : > { %4139 = vmatpush3.bf16.msra.mxu0 %v4491_v48  ;;  %v4549_v48 = vld [vmem:[%s5541_s3 + $0x80] sm:$0xff]  }
  0x60   : > { %4159 = vmatpush3.bf16.msra.mxu1 %v4492_v49  ;;  %4140 = vmatprep.subr.bf16.mxu0 %v4493_v50  ;;  %v4550_v49 = vld [vmem:[%s5541_s3 + $0xc0] sm:$0xff]  }
  0x61   : > { %4160 = vmatprep.subr.bf16.mxu1 %v4494_v51 }
  0x63   : > { %4141 = vmatpush3.bf16.msra.mxu0 %v4493_v50  ;;  %v3463_v50 = vld [vmem:[%s5544_s6] ss:$0 sm:$0xff] }
  0x64   : > { %4161 = vmatpush3.bf16.msra.mxu1 %v4494_v51  ;;  %4142 = vmatprep.subr.bf16.mxu0 %v4495_v52  ;;  %v3476_v51 = vld [vmem:[%s5546_s8] ss:$0 sm:$0xff] }
  0x65   : > { %4162 = vmatprep.subr.bf16.mxu1 %v4496_v53 }
  0x67   : > { %4143 = vmatpush3.bf16.msra.mxu0 %v4495_v52 }
  0x68   : > { %4163 = vmatpush3.bf16.msra.mxu1 %v4496_v53  ;;  %4144 = vmatprep.subr.bf16.mxu0 %v4497_v54 }
  0x69   : > { %4164 = vmatprep.subr.bf16.mxu1 %v4498_v55 }
  0x6b   : > { %4145 = vmatpush3.bf16.msra.mxu0 %v4497_v54 }
  0x6c   : > { %4165 = vmatpush3.bf16.msra.mxu1 %v4498_v55  ;;  %4146 = vmatprep.subr.bf16.mxu0 %v4499_v56 }
  0x6d   : > { %4166 = vmatprep.subr.bf16.mxu1 %v4500_v57 }
  0x6f   : > { %4147 = vmatpush3.bf16.msra.mxu0 %v4499_v56 }
  0x70   : > { %4167 = vmatpush3.bf16.msra.mxu1 %v4500_v57  ;;  %4148 = vmatprep.subr.bf16.mxu0 %v4501_v58 }
  0x71   : > { %4168 = vmatprep.subr.bf16.mxu1 %v4502_v59 }
  0x73   : > { %4149 = vmatpush3.bf16.msra.mxu0 %v4501_v58 }
  0x74   : > { %4169 = vmatpush3.bf16.msra.mxu1 %v4502_v59  ;;  %4174 = vmatprep.subr.bf16.mxu0 %v4503_v60 }
  0x75   : > { %4194 = vmatprep.subr.bf16.mxu1 %v4504_v61 }
  0x76   : > { %4151 = vmatmul.mubr.bf16.vlgmr.msra.gmra.mxu0 %v4921_v28 }
  0x77   : > { %4171 = vmatmul.mubr.bf16.vlgmr.msra.gmra.mxu1 %v4923_v29  ;;  %4175 = vmatpush3.bf16.msra.mxu0 %v4503_v60 }
  0x78   : > { %4195 = vmatpush3.bf16.msra.mxu1 %v4504_v61  ;;  %4176 = vmatprep.subr.bf16.mxu0 %v4505_v62 }
  0x79   : > { %4196 = vmatprep.subr.bf16.mxu1 %v4506_v63  ;;  %4190 = vmatprep.mubr.bf16.mxu0 %v4893_v14  ;;  %v1612_v14 = vld [vmem:[%s5079_s21] sm:$0xff]  ;;  %s432_s21 = sand.u32 1, %s4707_s18  }
  0x7a   : > { %4210 = vmatprep.mubr.bf16.mxu1 %v4897_v17  ;;  %v4522_v17 = vld [vmem:[%s5541_s3 + $0x70] sm:$0xff]   ;;  %v5095_v18 = vpack.c.bf16 %v1613_v15, %v1612_v14  ;;  %s3456_s13 = sshll.u32 %s432_s21, 5  ;;  %s5493_s12 = scalar_lea.sflag [#allocation6], %s432_s21 }
  0x7b   : > { %4177 = vmatpush3.bf16.msra.mxu0 %v4505_v62  ;;  %s434_s16 = scalar_lea.vmem [#allocation5], %s3456_s13  ;;  %s4725_s13 = smov [#allocation5]  }
  0x7c   : > { %4197 = vmatpush3.bf16.msra.mxu1 %v4506_v63  ;;  %4178 = vmatprep.subr.bf16.mxu0 %v4507_v0  ;;  %s3348_s23 = sshll.u32 %s434_s16, 4  ;;  %s4651_s14 = sshll.u32 %s4725_s13, 4  ;;  %s5484_s23 = int_to_ptr.vmem [resolvable:$true] %s3348_s23  ;;  %s4652_s14 = int_to_ptr.vmem [resolvable:$false] %s4651_s14 }
  0x7d   : > { %4198 = vmatprep.subr.bf16.mxu1 %v4508_v1  ;;  %s4647_s20 = scalar_lea.vmem %s5484_s23, 512  ;;  %s4653_s25 = scalar_lea.vmem %s4652_s14, 1024 }
  0x7e   : > { %p4648_p12 = scmp.ne.s32.totalorder %s5484_s23, %s4647_s20  ;;  %p4654_p1 = scmp.lt.s32.totalorder %s5484_s23, %s4652_s14 }
  0x7f   : > { %4179 = vmatpush3.bf16.msra.mxu0 %v4507_v0  ;;  %p4655_p2 = scmp.lt.s32.totalorder %s4653_s25, %s4647_s20 }
  0x80   : > { %4199 = vmatpush3.bf16.msra.mxu1 %v4508_v1  ;;  %4180 = vmatprep.subr.bf16.mxu0 %v4509_v2  ;;  %p4649_p13 = pnand %p4648_p12, %p4828_p4 }
  0x81   : > { %4200 = vmatprep.subr.bf16.mxu1 %v4510_v3  ;;  %p4656_p3 = por %p4655_p2, %p4654_p1 }
  0x82   : > { %p4650_p0 = pneg %p4649_p13 }
  0x83   : > { %4181 = vmatpush3.bf16.msra.mxu0 %v4509_v2 }
  0x84   : > { %4201 = vmatpush3.bf16.msra.mxu1 %v4510_v3  ;;  %4182 = vmatprep.subr.bf16.mxu0 %v4511_v4  ;;  %p4657_p5 = pnand %p4656_p3, %p4650_p0 }
  0x85   : > { %4202 = vmatprep.subr.bf16.mxu1 %v4512_v5 }
  0x87   : > { %4183 = vmatpush3.bf16.msra.mxu0 %v4511_v4 }
  0x88   : > { %4203 = vmatpush3.bf16.msra.mxu1 %v4512_v5  ;;  %4184 = vmatprep.subr.bf16.mxu0 %v4513_v6 }
  0x89   : > { %4204 = vmatprep.subr.bf16.mxu1 %v4514_v7 }
  0x8b   : > { %4185 = vmatpush3.bf16.msra.mxu0 %v4513_v6 }
  0x8c   : > { %4205 = vmatpush3.bf16.msra.mxu1 %v4514_v7  ;;  %4186 = vmatprep.subr.bf16.mxu0 %v4515_v8 }
  0x8d   : > { %4206 = vmatprep.subr.bf16.mxu1 %v4516_v9 }
  0x8f   : > { %4187 = vmatpush3.bf16.msra.mxu0 %v4515_v8 }
  0x90   : > { %4207 = vmatpush3.bf16.msra.mxu1 %v4516_v9  ;;  %4188 = vmatprep.subr.bf16.mxu0 %v4517_v10 }
  0x91   : > { %4208 = vmatprep.subr.bf16.mxu1 %v4518_v11 }
  0x93   : > { %4189 = vmatpush3.bf16.msra.mxu0 %v4517_v10 }
  0x94   : > { %4209 = vmatpush3.bf16.msra.mxu1 %v4518_v11  ;;  %4214 = vmatprep.subr.bf16.mxu0 %v4519_v12 }
  0x95   : > { %4234 = vmatprep.subr.bf16.mxu1 %v4520_v13 }
  0x96   : > { %4191 = vmatmul.mubr.bf16.vlgmr.msra.gmra.mxu0 %v4921_v28  ;;  %v4532_v28 = vld [vmem:[%s5541_s3 + $0x48] sm:$0xff]  }
  0x97   : > { %4211 = vmatmul.mubr.bf16.vlgmr.msra.gmra.mxu1 %v4923_v29  ;;  %4215 = vmatpush3.bf16.msra.mxu0 %v4519_v12  ;;  %v4533_v29 = vld [vmem:[%s5541_s3] sm:$0xff]  }
  0x98   : > { %4235 = vmatpush3.bf16.msra.mxu1 %v4520_v13  ;;  %4216 = vmatprep.subr.bf16.mxu0 %v4521_v16 }
  0x99   : > { %4236 = vmatprep.subr.bf16.mxu1 %v4522_v17  ;;  %4230 = vmatprep.mubr.bf16.mxu0 %v5095_v18 }
  0x9a   : > { %4250 = vmatprep.mubr.bf16.mxu1 %v5095_v18 }
  0x9b   : > { %4217 = vmatpush3.bf16.msra.mxu0 %v4521_v16  ;;  %v3506_v16 = vld [vmem:[%s5544_s6 + $0x1] ss:$0 sm:$0xff] }
  0x9c   : > { %4237 = vmatpush3.bf16.msra.mxu1 %v4522_v17  ;;  %4218 = vmatprep.subr.bf16.mxu0 %v4523_v19  ;;  %v3536_v17 = vld [vmem:[%s5546_s8 + $0x1] ss:$0 sm:$0xff] }
  0x9d   : > { %4238 = vmatprep.subr.bf16.mxu1 %v4524_v20 }
  0x9f   : > { %4219 = vmatpush3.bf16.msra.mxu0 %v4523_v19 }
  0xa0   : > { %4239 = vmatpush3.bf16.msra.mxu1 %v4524_v20  ;;  %4220 = vmatprep.subr.bf16.mxu0 %v4525_v21 }
  0xa1   : > { %4240 = vmatprep.subr.bf16.mxu1 %v4526_v22 }
  0xa3   : > { %4221 = vmatpush3.bf16.msra.mxu0 %v4525_v21 }
  0xa4   : > { %4241 = vmatpush3.bf16.msra.mxu1 %v4526_v22  ;;  %4222 = vmatprep.subr.bf16.mxu0 %v4527_v23 }
  0xa5   : > { %4242 = vmatprep.subr.bf16.mxu1 %v4528_v24 }
  0xa7   : > { %4223 = vmatpush3.bf16.msra.mxu0 %v4527_v23 }
  0xa8   : > { %4243 = vmatpush3.bf16.msra.mxu1 %v4528_v24  ;;  %4224 = vmatprep.subr.bf16.mxu0 %v4529_v25 }
  0xa9   : > { %4244 = vmatprep.subr.bf16.mxu1 %v4530_v26 }
  0xab   : > { %4225 = vmatpush3.bf16.msra.mxu0 %v4529_v25 }
  0xac   : > { %4245 = vmatpush3.bf16.msra.mxu1 %v4530_v26  ;;  %4226 = vmatprep.subr.bf16.mxu0 %v4531_v27 }
  0xad   : > { %4246 = vmatprep.subr.bf16.mxu1 %v4532_v28 }
  0xaf   : > { %4227 = vmatpush3.bf16.msra.mxu0 %v4531_v27 }
  0xb0   : > { %4247 = vmatpush3.bf16.msra.mxu1 %v4532_v28  ;;  %4228 = vmatprep.subr.bf16.mxu0 %v4533_v29 }
  0xb1   : > { %4248 = vmatprep.subr.bf16.mxu1 %v4534_v30 }
  0xb3   : > { %4229 = vmatpush3.bf16.msra.mxu0 %v4533_v29 }
  0xb4   : > { %4249 = vmatpush3.bf16.msra.mxu1 %v4534_v30  ;;  %4254 = vmatprep.subr.bf16.mxu0 %v4535_v33 }
  0xb5   : > { %4274 = vmatprep.subr.bf16.mxu1 %v4536_v34 }
  0xb6   : > { %4231 = vmatmul.mubr.bf16.vlgmr.msra.gmra.mxu0 %v1617_v35 }
  0xb7   : > { %4251 = vmatmul.mubr.bf16.vlgmr.msra.gmra.mxu1 %v1617_v35  ;;  %4255 = vmatpush3.bf16.msra.mxu0 %v4535_v33 }
  0xb8   : > { %4275 = vmatpush3.bf16.msra.mxu1 %v4536_v34  ;;  %4256 = vmatprep.subr.bf16.mxu0 %v4537_v36 }
  0xb9   : > { %4276 = vmatprep.subr.bf16.mxu1 %v4538_v37  ;;  %4270 = vmatprep.mubr.bf16.mxu0 %v5095_v18 }
  0xba   : > { %4290 = vmatprep.mubr.bf16.mxu1 %v5095_v18 }
  0xbb   : > { %4257 = vmatpush3.bf16.msra.mxu0 %v4537_v36 }
  0xbc   : > { %4277 = vmatpush3.bf16.msra.mxu1 %v4538_v37  ;;  %4258 = vmatprep.subr.bf16.mxu0 %v4539_v38 }
  0xbd   : > { %4278 = vmatprep.subr.bf16.mxu1 %v4540_v39 }
  0xbf   : > { %4259 = vmatpush3.bf16.msra.mxu0 %v4539_v38 }
  0xc0   : > { %4279 = vmatpush3.bf16.msra.mxu1 %v4540_v39  ;;  %4260 = vmatprep.subr.bf16.mxu0 %v4541_v40 }
  0xc1   : > { %4280 = vmatprep.subr.bf16.mxu1 %v4542_v41 }
  0xc3   : > { %4261 = vmatpush3.bf16.msra.mxu0 %v4541_v40 }
  0xc4   : > { %4281 = vmatpush3.bf16.msra.mxu1 %v4542_v41  ;;  %4262 = vmatprep.subr.bf16.mxu0 %v4543_v42 }
  0xc5   : > { %4282 = vmatprep.subr.bf16.mxu1 %v4544_v43 }
  0xc7   : > { %4263 = vmatpush3.bf16.msra.mxu0 %v4543_v42 }
  0xc8   : > { %4283 = vmatpush3.bf16.msra.mxu1 %v4544_v43  ;;  %4264 = vmatprep.subr.bf16.mxu0 %v4545_v44 }
  0xc9   : > { %4284 = vmatprep.subr.bf16.mxu1 %v4546_v45 }
  0xcb   : > { %4265 = vmatpush3.bf16.msra.mxu0 %v4545_v44 }
  0xcc   : > { %4285 = vmatpush3.bf16.msra.mxu1 %v4546_v45  ;;  %4266 = vmatprep.subr.bf16.mxu0 %v4547_v46 }
  0xcd   : > { %4286 = vmatprep.subr.bf16.mxu1 %v4548_v47 }
  0xcf   : > { %4267 = vmatpush3.bf16.msra.mxu0 %v4547_v46  ;;  %v3566_v46 = vld [vmem:[%s5544_s6 + $0x2] ss:$0 sm:$0xff] }
  0xd0   : > { %4287 = vmatpush3.bf16.msra.mxu1 %v4548_v47  ;;  %4268 = vmatprep.subr.bf16.mxu0 %v4549_v48  ;;  %v3596_v47 = vld [vmem:[%s5546_s8 + $0x2] ss:$0 sm:$0xff] }
  0xd1   : > { %4288 = vmatprep.subr.bf16.mxu1 %v4550_v49 }
  0xd3   : > { %4269 = vmatpush3.bf16.msra.mxu0 %v4549_v48 }
  0xd4   : > { %4289 = vmatpush3.bf16.msra.mxu1 %v4550_v49 }
  0xd6   : > { %4271 = vmatmul.mubr.bf16.vlgmr.msra.gmra.mxu0 %v1617_v35 }
  0xd7   : > { %4291 = vmatmul.mubr.bf16.vlgmr.msra.gmra.mxu1 %v1617_v35 }
  0xf6   : > { %v4072_v52 = vpop.f32.mrf.mxu0 }
  0xf7   : > { %v587_v53 = vadd.f32 %v4072_v52, %v3463_v50  ;;  %v4092_v54 = vpop.f32.mrf.mxu1 }
  0xf8   : > { %v728_v55 = vadd.f32 %v4092_v54, %v3476_v51  ;;  %v578_v56 = vpop.f32.mrf.mxu0 }
  0xf9   : > { %v3839_v57 = vpack.c.bf16 %v587_v53, %v587_v53  ;;  %v579_v58 = vadd.f32 %v3463_v50, %v578_v56  ;;  %v719_v59 = vpop.f32.mrf.mxu1 }
  0xfa   : > { %v3843_v60 = vpack.c.bf16 %v728_v55, %v728_v55  ;;  %v720_v61 = vadd.f32 %v3476_v51, %v719_v59  ;;  %v4073_v62 = vpop.f32.mrf.mxu0 }
  0xfb   : > { %612 = vst.msk [vmem:[#allocation3 + $0x8] sm:$0xf] %vm609_vm0, %v3839_v57  ;;  %v3837_v63 = vpack.c.bf16 %v579_v58, %v579_v58  ;;  %v590_v0 = vadd.f32 %v4073_v62, %v3463_v50  ;;  %v4093_v1 = vpop.f32.mrf.mxu1 }
  0xfc   : > { %752 = vst.msk [vmem:[#allocation4 + $0x8] sm:$0xf] %vm609_vm0, %v3843_v60  ;;  %v3841_v2 = vpack.c.bf16 %v720_v61, %v720_v61  ;;  %v731_v3 = vadd.f32 %v4093_v1, %v3476_v51  ;;  %v581_v4 = vpop.f32.mrf.mxu0 }
  0xfd   : > { %610 = vst.msk [vmem:[#allocation3] sm:$0xf] %vm609_vm0, %v3837_v63  ;;  %v3840_v5 = vpack.c.bf16 %v590_v0, %v590_v0  ;;  %v582_v6 = vadd.f32 %v3463_v50, %v581_v4  ;;  %v722_v7 = vpop.f32.mrf.mxu1 }
  0xfe   : > { %750 = vst.msk [vmem:[#allocation4] sm:$0xf] %vm609_vm0, %v3841_v2  ;;  %v3844_v8 = vpack.c.bf16 %v731_v3, %v731_v3  ;;  %v723_v9 = vadd.f32 %v3476_v51, %v722_v7 }
  0xff   : > { %613 = vst.msk [vmem:[#allocation3 + $0xc] sm:$0xf] %vm609_vm0, %v3840_v5  ;;  %v3838_v10 = vpack.c.bf16 %v582_v6, %v582_v6 }
 0x100   : > { %753 = vst.msk [vmem:[#allocation4 + $0xc] sm:$0xf] %vm609_vm0, %v3844_v8  ;;  %v3842_v11 = vpack.c.bf16 %v723_v9, %v723_v9  ;;  %v3626_v9 = vld [vmem:[%s5544_s6 + $0x3] ss:$0 sm:$0xff] }
 0x101   : > { %611 = vst.msk [vmem:[#allocation3 + $0x4] sm:$0xf] %vm609_vm0, %v3838_v10  ;;  %v3656_v10 = vld [vmem:[%s5546_s8 + $0x3] ss:$0 sm:$0xff] }
 0x102   : > { %751 = vst.msk [vmem:[#allocation4 + $0x4] sm:$0xf] %vm609_vm0, %v3842_v11 }
 0x106   : > { %v4551_v12 = vld [vmem:[#allocation3 + $0x8] sm:$0xff]  }
 0x107   : > { %4390 = vmatprep.subr.msk.bf16.mxu0 %vm2256_vm1, %v4551_v12  ;;  %v2267_v13 = vsel %vm2256_vm1, %v4551_v12, 0 }
 0x108   : > { %v4552_v14 = vld [vmem:[#allocation3] sm:$0xff]   ;;  %4295 = vmatpush3.bf16.xpose.msra.mxu0 %v2267_v13 }
 0x109   : > { %4391 = vmatprep.subr.msk.bf16.mxu0 %vm2256_vm1, %v4552_v14  ;;  %v2264_v15 = vsel %vm2256_vm1, %v4552_v14, 0 }
 0x110   : > { %4297 = vmatpush3.bf16.xpose.msra.mxu0 %v2264_v15 }
 0x116   : > { %v4112_v18 = vpop.f32.mrf.mxu0 }
 0x117   : > { %v870_v19 = vadd.f32 %v4112_v18, %v3506_v16  ;;  %v4132_v20 = vpop.f32.mrf.mxu1 }
 0x118   : > { %v1013_v21 = vadd.f32 %v4132_v20, %v3536_v17  ;;  %v861_v22 = vpop.f32.mrf.mxu0 }
 0x119   : > { %v3847_v23 = vpack.c.bf16 %v870_v19, %v870_v19  ;;  %v862_v24 = vadd.f32 %v3506_v16, %v861_v22  ;;  %v1004_v25 = vpop.f32.mrf.mxu1 }
 0x11a   : > { %v3851_v26 = vpack.c.bf16 %v1013_v21, %v1013_v21  ;;  %v1005_v27 = vadd.f32 %v3536_v17, %v1004_v25  ;;  %v4113_v28 = vpop.f32.mrf.mxu0 }
 0x11b   : > { %895 = vst.msk [vmem:[#allocation3 + $0x18] sm:$0xf] %vm609_vm0, %v3847_v23  ;;  %v3845_v29 = vpack.c.bf16 %v862_v24, %v862_v24  ;;  %v873_v30 = vadd.f32 %v4113_v28, %v3506_v16  ;;  %v4133_v31 = vpop.f32.mrf.mxu1 }
 0x11c   : > { %1038 = vst.msk [vmem:[#allocation4 + $0x18] sm:$0xf] %vm609_vm0, %v3851_v26  ;;  %v3849_v32 = vpack.c.bf16 %v1005_v27, %v1005_v27  ;;  %v1016_v33 = vadd.f32 %v4133_v31, %v3536_v17  ;;  %v864_v34 = vpop.f32.mrf.mxu0 }
 0x11d   : > { %893 = vst.msk [vmem:[#allocation3 + $0x10] sm:$0xf] %vm609_vm0, %v3845_v29  ;;  %v3848_v35 = vpack.c.bf16 %v873_v30, %v873_v30  ;;  %v865_v36 = vadd.f32 %v3506_v16, %v864_v34  ;;  %v1007_v37 = vpop.f32.mrf.mxu1 }
 0x11e   : > { %1036 = vst.msk [vmem:[#allocation4 + $0x10] sm:$0xf] %vm609_vm0, %v3849_v32  ;;  %v3852_v38 = vpack.c.bf16 %v1016_v33, %v1016_v33  ;;  %v1008_v39 = vadd.f32 %v3536_v17, %v1007_v37  ;;  %v3699_v37 = vld [vmem:[%s5542_s4 + $0x1] ss:$0 sm:$0xff] }
 0x11f   : > { %896 = vst.msk [vmem:[#allocation3 + $0x1c] sm:$0xf] %vm609_vm0, %v3848_v35  ;;  %v3846_v40 = vpack.c.bf16 %v865_v36, %v865_v36  ;;  %v3669_v36 = vld [vmem:[%s5542_s4] ss:$0 sm:$0xff] }
 0x120   : > { %1039 = vst.msk [vmem:[#allocation4 + $0x1c] sm:$0xf] %vm609_vm0, %v3852_v38  ;;  %v3850_v41 = vpack.c.bf16 %v1008_v39, %v1008_v39 }
 0x121   : > { %894 = vst.msk [vmem:[#allocation3 + $0x14] sm:$0xf] %vm609_vm0, %v3846_v40 }
 0x122   : > { %1037 = vst.msk [vmem:[#allocation4 + $0x14] sm:$0xf] %vm609_vm0, %v3850_v41 }
 0x126   : > { %v4553_v42 = vld [vmem:[#allocation3 + $0x18] sm:$0xff]  }
 0x127   : > { %4392 = vmatprep.subr.msk.bf16.mxu1 %vm2256_vm1, %v4553_v42  ;;  %v2348_v43 = vsel %vm2256_vm1, %v4553_v42, 0 }
 0x128   : > { %v4554_v44 = vld [vmem:[#allocation3 + $0x10] sm:$0xff]   ;;  %4303 = vmatpush3.bf16.xpose.msra.mxu1 %v2348_v43 }
 0x129   : > { %4393 = vmatprep.subr.msk.bf16.mxu1 %vm2256_vm1, %v4554_v44  ;;  %v2345_v45 = vsel %vm2256_vm1, %v4554_v44, 0 }
 0x130   : > { %4305 = vmatpush3.bf16.xpose.msra.mxu1 %v2345_v45 }
 0x136   : > { %v4152_v48 = vpop.f32.mrf.mxu0 }
 0x137   : > { %v1156_v49 = vadd.f32 %v4152_v48, %v3566_v46  ;;  %v4172_v50 = vpop.f32.mrf.mxu1 }
 0x138   : > { %v1299_v51 = vadd.f32 %v4172_v50, %v3596_v47  ;;  %v1147_v52 = vpop.f32.mrf.mxu0 }
 0x139   : > { %v3855_v53 = vpack.c.bf16 %v1156_v49, %v1156_v49  ;;  %v1148_v54 = vadd.f32 %v3566_v46, %v1147_v52  ;;  %v1290_v55 = vpop.f32.mrf.mxu1 }
 0x13a   : > { %v3859_v56 = vpack.c.bf16 %v1299_v51, %v1299_v51  ;;  %v1291_v57 = vadd.f32 %v3596_v47, %v1290_v55  ;;  %v4153_v58 = vpop.f32.mrf.mxu0 }
 0x13b   : > { %1181 = vst.msk [vmem:[#allocation3 + $0x28] sm:$0xf] %vm609_vm0, %v3855_v53  ;;  %v3853_v59 = vpack.c.bf16 %v1148_v54, %v1148_v54  ;;  %v1159_v60 = vadd.f32 %v4153_v58, %v3566_v46  ;;  %v4173_v61 = vpop.f32.mrf.mxu1 }
 0x13c   : > { %1324 = vst.msk [vmem:[#allocation4 + $0x28] sm:$0xf] %vm609_vm0, %v3859_v56  ;;  %v3857_v62 = vpack.c.bf16 %v1291_v57, %v1291_v57  ;;  %v1302_v63 = vadd.f32 %v4173_v61, %v3596_v47  ;;  %v1150_v0 = vpop.f32.mrf.mxu0 }
 0x13d   : > { %1179 = vst.msk [vmem:[#allocation3 + $0x20] sm:$0xf] %vm609_vm0, %v3853_v59  ;;  %v3856_v1 = vpack.c.bf16 %v1159_v60, %v1159_v60  ;;  %v1151_v2 = vadd.f32 %v3566_v46, %v1150_v0  ;;  %v1293_v3 = vpop.f32.mrf.mxu1 }
 0x13e   : > { %1322 = vst.msk [vmem:[#allocation4 + $0x20] sm:$0xf] %vm609_vm0, %v3857_v62  ;;  %v3860_v4 = vpack.c.bf16 %v1302_v63, %v1302_v63  ;;  %v1294_v5 = vadd.f32 %v3596_v47, %v1293_v3 }
 0x13f   : > { %1182 = vst.msk [vmem:[#allocation3 + $0x2c] sm:$0xf] %vm609_vm0, %v3856_v1  ;;  %v3854_v6 = vpack.c.bf16 %v1151_v2, %v1151_v2 }
 0x140   : > { %1325 = vst.msk [vmem:[#allocation4 + $0x2c] sm:$0xf] %vm609_vm0, %v3860_v4  ;;  %v3858_v7 = vpack.c.bf16 %v1294_v5, %v1294_v5 }
 0x141   : > { %1180 = vst.msk [vmem:[#allocation3 + $0x24] sm:$0xf] %vm609_vm0, %v3854_v6 }
 0x142   : > { %1323 = vst.msk [vmem:[#allocation4 + $0x24] sm:$0xf] %vm609_vm0, %v3858_v7  ;;  %v4563_v7 = vld [vmem:[#allocation4 + $0x8] sm:$0xff]  }
 0x146   : > { %v5239_v8 = vld [vmem:[#allocation3 + $0x28] sm:$0xff]  }
 0x147   : > { %4394 = vmatprep.subr.msk.bf16.mxu0 %vm2256_vm1, %v5239_v8  ;;  %v2429_v2 = vsel %vm2256_vm1, %v5239_v8, 0  ;;  %v3729_v8 = vld [vmem:[%s5542_s4 + $0x2] ss:$0 sm:$0xff] }
 0x148   : > { %v4561_v3 = vld [vmem:[#allocation3 + $0x20] sm:$0xff]  }
 0x149   : > { %v2426_v6 = vsel %vm2256_vm1, %v4561_v3, 0 }
 0x156   : > { %v4192_v11 = vpop.f32.mrf.mxu0 }
 0x157   : > { %v1442_v12 = vadd.f32 %v4192_v11, %v3626_v9  ;;  %v4212_v13 = vpop.f32.mrf.mxu1  ;;  %v3759_v11 = vld [vmem:[%s5542_s4 + $0x3] ss:$0 sm:$0xff] }
 0x158   : > { %v1585_v14 = vadd.f32 %v4212_v13, %v3656_v10  ;;  %v1433_v15 = vpop.f32.mrf.mxu0 }
 0x159   : > { %v3863_v16 = vpack.c.bf16 %v1442_v12, %v1442_v12  ;;  %v1434_v17 = vadd.f32 %v3626_v9, %v1433_v15  ;;  %v1576_v18 = vpop.f32.mrf.mxu1 }
 0x15a   : > { %v3867_v19 = vpack.c.bf16 %v1585_v14, %v1585_v14  ;;  %v1577_v20 = vadd.f32 %v3656_v10, %v1576_v18  ;;  %v4193_v21 = vpop.f32.mrf.mxu0 }
 0x15b   : > { %1467 = vst.msk [vmem:[#allocation3 + $0x38] sm:$0xf] %vm609_vm0, %v3863_v16  ;;  %v3861_v22 = vpack.c.bf16 %v1434_v17, %v1434_v17  ;;  %v1445_v23 = vadd.f32 %v4193_v21, %v3626_v9  ;;  %v4213_v24 = vpop.f32.mrf.mxu1 }
 0x15c   : > { %1610 = vst.msk [vmem:[#allocation4 + $0x38] sm:$0xf] %vm609_vm0, %v3867_v19  ;;  %v3865_v25 = vpack.c.bf16 %v1577_v20, %v1577_v20  ;;  %v1588_v26 = vadd.f32 %v4213_v24, %v3656_v10  ;;  %v1436_v27 = vpop.f32.mrf.mxu0 }
 0x15d   : > { %1465 = vst.msk [vmem:[#allocation3 + $0x30] sm:$0xf] %vm609_vm0, %v3861_v22  ;;  %v3864_v28 = vpack.c.bf16 %v1445_v23, %v1445_v23  ;;  %v1437_v29 = vadd.f32 %v3626_v9, %v1436_v27  ;;  %v1579_v30 = vpop.f32.mrf.mxu1 }
 0x15e   : > { %1608 = vst.msk [vmem:[#allocation4 + $0x30] sm:$0xf] %vm609_vm0, %v3865_v25  ;;  %v3868_v31 = vpack.c.bf16 %v1588_v26, %v1588_v26  ;;  %v1580_v32 = vadd.f32 %v3656_v10, %v1579_v30  ;;  %v4564_v10 = vld [vmem:[#allocation4 + $0x18] sm:$0xff]  }
 0x15f   : > { %1468 = vst.msk [vmem:[#allocation3 + $0x3c] sm:$0xf] %vm609_vm0, %v3864_v28  ;;  %v3862_v33 = vpack.c.bf16 %v1437_v29, %v1437_v29 }
 0x160   : > { %1611 = vst.msk [vmem:[#allocation4 + $0x3c] sm:$0xf] %vm609_vm0, %v3868_v31  ;;  %v3866_v34 = vpack.c.bf16 %v1580_v32, %v1580_v32 }
 0x161   : > { %1466 = vst.msk [vmem:[#allocation3 + $0x34] sm:$0xf] %vm609_vm0, %v3862_v33 }
 0x162   : > { %1609 = vst.msk [vmem:[#allocation4 + $0x34] sm:$0xf] %vm609_vm0, %v3866_v34 }
 0x166   : > { %v4556_v35 = vld [vmem:[#allocation3 + $0x38] sm:$0xff]  }
 0x167   : > { %4396 = vmatprep.subr.msk.bf16.mxu1 %vm2256_vm1, %v4556_v35  ;;  %v2510_v4 = vsel %vm2256_vm1, %v4556_v35, 0 }
 0x168   : > { %v4562_v5 = vld [vmem:[#allocation3 + $0x30] sm:$0xff]  }
 0x169   : > { %v2507_v9 = vsel %vm2256_vm1, %v4562_v5, 0 }
 0x176   : > { %v4232_v38 = vpop.f32.mrf.mxu0 }
 0x177   : > { %v1732_v39 = vadd.f32 %v4232_v38, %v3669_v36  ;;  %v4252_v40 = vpop.f32.mrf.mxu1 }
 0x178   : > { %v1875_v41 = vadd.f32 %v4252_v40, %v3699_v37  ;;  %v1723_v42 = vpop.f32.mrf.mxu0  ;;  %v4569_v40 = vld [vmem:[#allocation4] sm:$0xff]  }
 0x179   : > { %v3871_v43 = vpack.c.bf16 %v1732_v39, %v1732_v39  ;;  %v1724_v44 = vadd.f32 %v3669_v36, %v1723_v42  ;;  %v1866_v45 = vpop.f32.mrf.mxu1  ;;  %v5301_v42 = vld [vmem:[#allocation4 + $0x28] sm:$0xff]  }
 0x17a   : > { %v3875_v46 = vpack.c.bf16 %v1875_v41, %v1875_v41  ;;  %v1867_v47 = vadd.f32 %v3699_v37, %v1866_v45  ;;  %v4233_v48 = vpop.f32.mrf.mxu0  ;;  %v4570_v41 = vld [vmem:[#allocation4 + $0x10] sm:$0xff]  }
 0x17b   : > { %1757 = vst.msk [vmem:[#allocation2 + $0x8] sm:$0xf] %vm609_vm0, %v3871_v43  ;;  %v3869_v49 = vpack.c.bf16 %v1724_v44, %v1724_v44  ;;  %v1735_v50 = vadd.f32 %v4233_v48, %v3669_v36  ;;  %v4253_v51 = vpop.f32.mrf.mxu1  ;;  %v5303_v43 = vld [vmem:[#allocation4 + $0x38] sm:$0xff]  }
 0x17c   : > { %1900 = vst.msk [vmem:[#allocation2 + $0x18] sm:$0xf] %vm609_vm0, %v3875_v46  ;;  %v3873_v52 = vpack.c.bf16 %v1867_v47, %v1867_v47  ;;  %v1878_v53 = vadd.f32 %v4253_v51, %v3699_v37  ;;  %v1726_v54 = vpop.f32.mrf.mxu0 }
 0x17d   : > { %1755 = vst.msk [vmem:[#allocation2] sm:$0xf] %vm609_vm0, %v3869_v49  ;;  %v3872_v55 = vpack.c.bf16 %v1735_v50, %v1735_v50  ;;  %v1727_v56 = vadd.f32 %v3669_v36, %v1726_v54  ;;  %v1869_v57 = vpop.f32.mrf.mxu1 }
 0x17e   : > { %1898 = vst.msk [vmem:[#allocation2 + $0x10] sm:$0xf] %vm609_vm0, %v3873_v52  ;;  %v3876_v58 = vpack.c.bf16 %v1878_v53, %v1878_v53  ;;  %v1870_v59 = vadd.f32 %v3699_v37, %v1869_v57 }
 0x17f   : > { %1758 = vst.msk [vmem:[#allocation2 + $0xc] sm:$0xf] %vm609_vm0, %v3872_v55  ;;  %v3870_v60 = vpack.c.bf16 %v1727_v56, %v1727_v56 }
 0x180   : > { %1901 = vst.msk [vmem:[#allocation2 + $0x1c] sm:$0xf] %vm609_vm0, %v3876_v58  ;;  %v3874_v61 = vpack.c.bf16 %v1870_v59, %v1870_v59 }
 0x181   : > { %1756 = vst.msk [vmem:[#allocation2 + $0x4] sm:$0xf] %vm609_vm0, %v3870_v60 }
 0x182   : > { %1899 = vst.msk [vmem:[#allocation2 + $0x14] sm:$0xf] %vm609_vm0, %v3874_v61 }
 0x186   : > { %v4559_v1 = vld [vmem:[#allocation2 + $0x8] sm:$0xff]  }
 0x187   : > { %v4560_v63 = vld [vmem:[#allocation2 + $0x18] sm:$0xff]  }
 0x188   : > { %v4557_v62 = vld [vmem:[#allocation2] sm:$0xff]  }
 0x189   : > { %v4558_v0 = vld [vmem:[#allocation2 + $0x10] sm:$0xff]   ;;  %4298 = vmatprep.mubr.msk.bf16.mxu0 %vm2256_vm1, %v4557_v62 }
 0x18a   : > { %4306 = vmatprep.mubr.msk.bf16.mxu1 %vm2256_vm1, %v4558_v0  ;;  %4299 = vmatmul.mubr.msk.bf16.vlgmr.msra.gmra.mxu0 %vm2256_vm1, %v4559_v1 }
 0x18b   : > { %4307 = vmatmul.mubr.msk.bf16.vlgmr.msra.gmra.mxu1 %vm2256_vm1, %v4560_v63  ;;  %4311 = vmatpush3.bf16.xpose.msra.mxu0 %v2429_v2 }
 0x18c   : > { %4319 = vmatpush3.bf16.xpose.msra.mxu1 %v2510_v4  ;;  %4395 = vmatprep.subr.msk.bf16.mxu0 %vm2256_vm1, %v4561_v3 }
 0x18d   : > { %4397 = vmatprep.subr.msk.bf16.mxu1 %vm2256_vm1, %v4562_v5 }
 0x193   : > { %4313 = vmatpush3.bf16.xpose.msra.mxu0 %v2426_v6 }
 0x194   : > { %4321 = vmatpush3.bf16.xpose.msra.mxu1 %v2507_v9  ;;  %4326 = vmatprep.subr.bf16.mxu0 %v4563_v7 }
 0x195   : > { %4334 = vmatprep.subr.bf16.mxu1 %v4564_v10 }
 0x196   : > { %v4272_v12 = vpop.f32.mrf.mxu0 }
 0x197   : > { %v2018_v13 = vadd.f32 %v4272_v12, %v3729_v8  ;;  %v4292_v14 = vpop.f32.mrf.mxu1 }
 0x198   : > { %v2161_v15 = vadd.f32 %v4292_v14, %v3759_v11  ;;  %v2009_v16 = vpop.f32.mrf.mxu0 }
 0x199   : > { %v3879_v17 = vpack.c.bf16 %v2018_v13, %v2018_v13  ;;  %v2010_v18 = vadd.f32 %v3729_v8, %v2009_v16  ;;  %v2152_v19 = vpop.f32.mrf.mxu1 }
 0x19a   : > { %v3883_v20 = vpack.c.bf16 %v2161_v15, %v2161_v15  ;;  %v2153_v21 = vadd.f32 %v3759_v11, %v2152_v19  ;;  %v4273_v22 = vpop.f32.mrf.mxu0 }
 0x19b   : > { %2043 = vst.msk [vmem:[#allocation2 + $0x28] sm:$0xf] %vm609_vm0, %v3879_v17  ;;  %v3877_v23 = vpack.c.bf16 %v2010_v18, %v2010_v18  ;;  %v2021_v24 = vadd.f32 %v4273_v22, %v3729_v8  ;;  %v4293_v25 = vpop.f32.mrf.mxu1 }
 0x19c   : > { %2186 = vst.msk [vmem:[#allocation2 + $0x38] sm:$0xf] %vm609_vm0, %v3883_v20  ;;  %v3881_v26 = vpack.c.bf16 %v2153_v21, %v2153_v21  ;;  %v2164_v27 = vadd.f32 %v4293_v25, %v3759_v11  ;;  %v2012_v28 = vpop.f32.mrf.mxu0 }
 0x19d   : > { %2041 = vst.msk [vmem:[#allocation2 + $0x20] sm:$0xf] %vm609_vm0, %v3877_v23  ;;  %v3880_v29 = vpack.c.bf16 %v2021_v24, %v2021_v24  ;;  %v2013_v30 = vadd.f32 %v3729_v8, %v2012_v28  ;;  %v2155_v31 = vpop.f32.mrf.mxu1 }
 0x19e   : > { %2184 = vst.msk [vmem:[#allocation2 + $0x30] sm:$0xf] %vm609_vm0, %v3881_v26  ;;  %v3884_v32 = vpack.c.bf16 %v2164_v27, %v2164_v27  ;;  %v2156_v33 = vadd.f32 %v3759_v11, %v2155_v31 }
 0x19f   : > { %2044 = vst.msk [vmem:[#allocation2 + $0x2c] sm:$0xf] %vm609_vm0, %v3880_v29  ;;  %v3878_v34 = vpack.c.bf16 %v2013_v30, %v2013_v30 }
 0x1a0   : > { %2187 = vst.msk [vmem:[#allocation2 + $0x3c] sm:$0xf] %vm609_vm0, %v3884_v32  ;;  %v3882_v35 = vpack.c.bf16 %v2156_v33, %v2156_v33 }
 0x1a1   : > { %2042 = vst.msk [vmem:[#allocation2 + $0x24] sm:$0xf] %vm609_vm0, %v3878_v34 }
 0x1a2   : > { %2185 = vst.msk [vmem:[#allocation2 + $0x34] sm:$0xf] %vm609_vm0, %v3882_v35 }
 0x1a6   : > { %v4567_v39 = vld [vmem:[#allocation2 + $0x28] sm:$0xff]  }
 0x1a7   : > { %v4568_v37 = vld [vmem:[#allocation2 + $0x38] sm:$0xff]  }
 0x1a8   : > { %v4565_v36 = vld [vmem:[#allocation2 + $0x20] sm:$0xff]  }
 0x1a9   : > { %v4566_v38 = vld [vmem:[#allocation2 + $0x30] sm:$0xff]   ;;  %4314 = vmatprep.mubr.msk.bf16.mxu0 %vm2256_vm1, %v4565_v36 }
 0x1aa   : > { %4322 = vmatprep.mubr.msk.bf16.mxu1 %vm2256_vm1, %v4566_v38  ;;  %4315 = vmatmul.mubr.msk.bf16.vlgmr.msra.gmra.mxu0 %vm2256_vm1, %v4567_v39 }
 0x1ab   : > { %4323 = vmatmul.mubr.msk.bf16.vlgmr.msra.gmra.mxu1 %vm2256_vm1, %v4568_v37  ;;  %4327 = vmatpush3.bf16.msra.mxu0 %v4563_v7 }
 0x1ac   : > { %4335 = vmatpush3.bf16.msra.mxu1 %v4564_v10  ;;  %4328 = vmatprep.subr.bf16.mxu0 %v4569_v40 }
 0x1ad   : > { %4336 = vmatprep.subr.bf16.mxu1 %v4570_v41 }
 0x1af   : > { %4329 = vmatpush3.bf16.msra.mxu0 %v4569_v40 }
 0x1b0   : > { %4337 = vmatpush3.bf16.msra.mxu1 %v4570_v41  ;;  %4342 = vmatprep.subr.bf16.mxu0 %v5301_v42 }
 0x1b1   : > { %4350 = vmatprep.subr.bf16.mxu1 %v5303_v43 }
 0x24a   : > { %v4300_v44 = vpop.f32.mrf.mxu0 }
 0x24b   : > { %v4308_v45 = vpop.f32.mrf.mxu1  ;;  %v2567_v46 = vsel %vm2256_vm1, %v4300_v44, -inf }
 0x24c   : > { %v2579_v47 = vsel %vm2256_vm1, %v4308_v45, -inf  ;;  %2568 = vmax.xlane.f32.xlu1 %v2567_v46  ;;  %v2303_v48 = vpop.f32.mrf.mxu0 }
 0x24d   : > { %2580 = vmax.xlane.f32.xlu0 %v2579_v47  ;;  %v2384_v49 = vpop.f32.mrf.mxu1  ;;  %v2561_v53 = vsel %vm2256_vm1, %v2303_v48, -inf }
 0x24e   : > { %v4301_v50 = vpop.f32.mrf.mxu0  ;;  %v2573_v56 = vsel %vm2256_vm1, %v2384_v49, -inf }
 0x24f   : > { %v2570_v51 = vsel %vm2256_vm1, %v4301_v50, -inf  ;;  %v4309_v52 = vpop.f32.mrf.mxu1 }
 0x250   : > { %2571 = vmax.xlane.f32.xlu1 %v2570_v51  ;;  %v2582_v54 = vsel %vm2256_vm1, %v4309_v52, -inf  ;;  %v2306_v57 = vpop.f32.mrf.mxu0 }
 0x251   : > { %2562 = vmax.xlane.f32.xlu0 %v2561_v53  ;;  %v2387_v55 = vpop.f32.mrf.mxu1  ;;  %v2564_v59 = vsel %vm2256_vm1, %v2306_v57, -inf }
 0x252   : > { %v2576_v58 = vsel %vm2256_vm1, %v2387_v55, -inf }
 0x254   : > { %2583 = vmax.xlane.f32.xlu1 %v2582_v54 }
 0x255   : > { %2574 = vmax.xlane.f32.xlu0 %v2573_v56 }
 0x258   : > { %2577 = vmax.xlane.f32.xlu1 %v2576_v58 }
 0x259   : > { %2565 = vmax.xlane.f32.xlu0 %v2564_v59 }
 0x26a   : > { %v5315_v60 = vpop.f32.mrf.mxu0 }
 0x26b   : > { %v5317_v61 = vpop.f32.mrf.mxu1  ;;  %v2591_v62 = vsel %vm2256_vm1, %v5315_v60, -inf }
 0x26c   : > { %2592 = vmax.xlane.f32.xlu0 %v2591_v62  ;;  %v5321_v63 = vpop.f32.mrf.mxu0  ;;  %v2603_v10 = vsel %vm2256_vm1, %v5317_v61, -inf }
 0x26d   : > { %v5323_v0 = vpop.f32.mrf.mxu1  ;;  %v2585_v2 = vsel %vm2256_vm1, %v5321_v63, -inf }
 0x26e   : > { %v5325_v1 = vpop.f32.mrf.mxu0  ;;  %v2597_v6 = vsel %vm2256_vm1, %v5323_v0, -inf }
 0x26f   : > { %v2594_v3 = vsel %vm2256_vm1, %v5325_v1, -inf  ;;  %v5331_v4 = vpop.f32.mrf.mxu1 }
 0x270   : > { %2586 = vmax.xlane.f32.xlu0 %v2585_v2  ;;  %2595 = vmax.xlane.f32.xlu1 %v2594_v3  ;;  %v5333_v5 = vpop.f32.mrf.mxu0  ;;  %v2606_v11 = vsel %vm2256_vm1, %v5331_v4, -inf }
 0x271   : > { %v2588_v7 = vsel %vm2256_vm1, %v5333_v5, -inf  ;;  %v5339_v9 = vpop.f32.mrf.mxu1 }
 0x272   : > { %v2600_v8 = vsel %vm2256_vm1, %v5339_v9, -inf }
 0x274   : > { %2598 = vmax.xlane.f32.xlu0 %v2597_v6  ;;  %2589 = vmax.xlane.f32.xlu1 %v2588_v7 }
 0x278   : > { %2604 = vmax.xlane.f32.xlu0 %v2603_v10  ;;  %2601 = vmax.xlane.f32.xlu1 %v2600_v8 }
 0x27c   : > { %2607 = vmax.xlane.f32.xlu1 %v2606_v11 }
 0x2d5   : > { %v2569_v12 = vpop.xlane.xlu1 %2568 }
 0x2d6   : > { %v2581_v13 = vpop.xlane.xlu0 %2580  ;;  %v2611_v14 = vsub.f32 %v4300_v44, %v2569_v12 }
 0x2d7   : > { %v2615_v15 = vsub.f32 %v4308_v45, %v2581_v13 }
 0x2d8   : > { %v2629_v16 = vmul.f32 1.442695, %v2611_v14 }
 0x2d9   : > { %v2637_v17 = vmul.f32 1.442695, %v2615_v15  ;;  %v2572_v18 = vpop.xlane.xlu1 %2571 }
 0x2da   : > { %4583 = vpow2.f32 %v2629_v16  ;;  %v2563_v19 = vpop.xlane.xlu0 %2562  ;;  %v2612_v20 = vsub.f32 %v4301_v50, %v2572_v18 }
 0x2db   : > { %v2609_v21 = vsub.f32 %v2303_v48, %v2563_v19  ;;  %4585 = vpow2.f32 %v2637_v17 }
 0x2dc   : > { %v2631_v22 = vmul.f32 1.442695, %v2612_v20 }
 0x2dd   : > { %v2625_v23 = vmul.f32 1.442695, %v2609_v21  ;;  %v2584_v24 = vpop.xlane.xlu1 %2583 }
 0x2de   : > { %4587 = vpow2.f32 %v2631_v22  ;;  %v2575_v25 = vpop.xlane.xlu0 %2574  ;;  %v2616_v26 = vsub.f32 %v4309_v52, %v2584_v24 }
 0x2df   : > { %v2613_v27 = vsub.f32 %v2384_v49, %v2575_v25  ;;  %4589 = vpow2.f32 %v2625_v23 }
 0x2e0   : > { %v2639_v28 = vmul.f32 1.442695, %v2616_v26 }
 0x2e1   : > { %v2633_v29 = vmul.f32 1.442695, %v2613_v27  ;;  %v2578_v30 = vpop.xlane.xlu1 %2577 }
 0x2e2   : > { %4591 = vpow2.f32 %v2639_v28  ;;  %v2614_v31 = vsub.f32 %v2387_v55, %v2578_v30  ;;  %v2566_v32 = vpop.xlane.xlu0 %2565 }
 0x2e3   : > { %v2610_v33 = vsub.f32 %v2306_v57, %v2566_v32  ;;  %4593 = vpow2.f32 %v2633_v29 }
 0x2e4   : > { %v2635_v34 = vmul.f32 1.442695, %v2614_v31 }
 0x2e5   : > { %v2627_v35 = vmul.f32 1.442695, %v2610_v33 }
 0x2e7   : > { %v5347_v36 = vpop.eup %4583  ;;  %4595 = vpow2.f32 %v2627_v35 }
 0x2e8   : > { %v2663_v37 = vsel %vm2256_vm1, %v5347_v36, 0.0  ;;  %v5351_v38 = vpop.eup %4585  ;;  %4597 = vpow2.f32 %v2635_v34 }
 0x2e9   : > { %2664 = vadd.xlane.f32.xlu0 %v2663_v37  ;;  %v2675_v40 = vsel %vm2256_vm1, %v5351_v38, 0.0 }
 0x2eb   : > { %v5353_v39 = vpop.eup %4587 }
 0x2ec   : > { %v2666_v41 = vsel %vm2256_vm1, %v5353_v39, 0.0  ;;  %v5359_v44 = vpop.eup %4589 }
 0x2ed   : > { %2676 = vadd.xlane.f32.xlu0 %v2675_v40  ;;  %2667 = vadd.xlane.f32.xlu1 %v2666_v41  ;;  %v2657_v46 = vsel %vm2256_vm1, %v5359_v44, 0.0 }
 0x2ef   : > { %v5361_v45 = vpop.eup %4591 }
 0x2f0   : > { %v2678_v47 = vsel %vm2256_vm1, %v5361_v45, 0.0  ;;  %v5367_v48 = vpop.eup %4593 }
 0x2f1   : > { %2658 = vadd.xlane.f32.xlu0 %v2657_v46  ;;  %2679 = vadd.xlane.f32.xlu1 %v2678_v47  ;;  %v2669_v50 = vsel %vm2256_vm1, %v5367_v48, 0.0 }
 0x2f4   : > { %v5369_v49 = vpop.eup %4595 }
 0x2f5   : > { %v2593_v51 = vpop.xlane.xlu0 %2592  ;;  %2670 = vadd.xlane.f32.xlu0 %v2669_v50  ;;  %v2660_v52 = vsel %vm2256_vm1, %v5369_v49, 0.0  ;;  %v5375_v53 = vpop.eup %4597 }
 0x2f6   : > { %v2619_v54 = vsub.f32 %v5315_v60, %v2593_v51  ;;  %2661 = vadd.xlane.f32.xlu1 %v2660_v52  ;;  %v2672_v58 = vsel %vm2256_vm1, %v5375_v53, 0.0 }
 0x2f8   : > { %v2645_v55 = vmul.f32 1.442695, %v2619_v54 }
 0x2f9   : > { %v2587_v56 = vpop.xlane.xlu0 %2586  ;;  %v2596_v57 = vpop.xlane.xlu1 %2595 }
 0x2fa   : > { %4599 = vpow2.f32 %v2645_v55  ;;  %v2617_v59 = vsub.f32 %v5321_v63, %v2587_v56  ;;  %v2620_v62 = vsub.f32 %v5325_v1, %v2596_v57  ;;  %2673 = vadd.xlane.f32.xlu1 %v2672_v58 }
 0x2fc   : > { %v2641_v2 = vmul.f32 1.442695, %v2617_v59  ;;  %v2647_v3 = vmul.f32 1.442695, %v2620_v62 }
 0x2fd   : > { %v2599_v6 = vpop.xlane.xlu0 %2598  ;;  %v2590_v7 = vpop.xlane.xlu1 %2589 }
 0x2fe   : > { %4601 = vpow2.f32 %v2641_v2  ;;  %v2621_v60 = vsub.f32 %v5323_v0, %v2599_v6  ;;  %v2618_v10 = vsub.f32 %v5333_v5, %v2590_v7 }
 0x2ff   : > { %4603 = vpow2.f32 %v2647_v3 }
 0x300   : > { %v2649_v8 = vmul.f32 1.442695, %v2621_v60  ;;  %v2643_v11 = vmul.f32 1.442695, %v2618_v10 }
 0x301   : > { %v2605_v12 = vpop.xlane.xlu0 %2604  ;;  %v2602_v13 = vpop.xlane.xlu1 %2601 }
 0x302   : > { %4605 = vpow2.f32 %v2649_v8  ;;  %v2623_v63 = vsub.f32 %v5317_v61, %v2605_v12  ;;  %v2622_v1 = vsub.f32 %v5339_v9, %v2602_v13  ;;  %v4574_v8 = vld [vmem:[#allocation4 + $0x30] sm:$0xff]  }
 0x303   : > { %4607 = vpow2.f32 %v2643_v11 }
 0x304   : > { %v2653_v14 = vmul.f32 1.442695, %v2623_v63  ;;  %v2651_v15 = vmul.f32 1.442695, %v2622_v1 }
 0x305   : > { %v2608_v16 = vpop.xlane.xlu1 %2607 }
 0x306   : > { %4609 = vpow2.f32 %v2653_v14  ;;  %v2624_v17 = vsub.f32 %v5331_v4, %v2608_v16 }
 0x307   : > { %v5387_v0 = vpop.eup %4599  ;;  %4611 = vpow2.f32 %v2651_v15 }
 0x308   : > { %v2655_v5 = vmul.f32 1.442695, %v2624_v17  ;;  %v2687_v18 = vsel %vm2256_vm1, %v5387_v0, 0.0 }
 0x309   : > { %2688 = vadd.xlane.f32.xlu0 %v2687_v18 }
 0x30a   : > { %4613 = vpow2.f32 %v2655_v5 }
 0x30b   : > { %v5391_v19 = vpop.eup %4601 }
 0x30c   : > { %v5393_v61 = vpop.eup %4603  ;;  %v2681_v9 = vsel %vm2256_vm1, %v5391_v19, 0.0 }
 0x30d   : > { %2682 = vadd.xlane.f32.xlu0 %v2681_v9  ;;  %v2690_v4 = vsel %vm2256_vm1, %v5393_v61, 0.0 }
 0x30e   : > { %2691 = vadd.xlane.f32.xlu1 %v2690_v4 }
 0x30f   : > { %v5399_v20 = vpop.eup %4605 }
 0x310   : > { %v5401_v21 = vpop.eup %4607  ;;  %v2693_v22 = vsel %vm2256_vm1, %v5399_v20, 0.0 }
 0x311   : > { %2694 = vadd.xlane.f32.xlu0 %v2693_v22  ;;  %v2684_v23 = vsel %vm2256_vm1, %v5401_v21, 0.0 }
 0x312   : > { %2685 = vadd.xlane.f32.xlu1 %v2684_v23 }
 0x313   : > { %v5407_v24 = vpop.eup %4609 }
 0x314   : > { %v5409_v25 = vpop.eup %4611  ;;  %v2699_v26 = vsel %vm2256_vm1, %v5407_v24, 0.0 }
 0x315   : > { %2700 = vadd.xlane.f32.xlu0 %v2699_v26  ;;  %v2696_v27 = vsel %vm2256_vm1, %v5409_v25, 0.0 }
 0x316   : > { %2697 = vadd.xlane.f32.xlu1 %v2696_v27  ;;  %v4578_v27 = vld [vmem:[%s5547_s9 + $0x10] sm:$0xff]  }
 0x317   : > { %v5415_v28 = vpop.eup %4613 }
 0x318   : > { %v2702_v29 = vsel %vm2256_vm1, %v5415_v28, 0.0 }
 0x31a   : > { %2703 = vadd.xlane.f32.xlu1 %v2702_v29  ;;  %v4581_v29 = vld [vmem:[%s5547_s9 + $0x38] sm:$0xff]  }
 0x372   : > { %v2665_v30 = vpop.xlane.xlu0 %2664 }
 0x376   : > { %v2677_v31 = vpop.xlane.xlu0 %2676  ;;  %v2668_v32 = vpop.xlane.xlu1 %2667 }
 0x377   : > { %4615 = vrcp.f32 %v2668_v32 }
 0x37a   : > { %v2659_v33 = vpop.xlane.xlu0 %2658  ;;  %v2680_v34 = vpop.xlane.xlu1 %2679 }
 0x37b   : > { %4617 = vrcp.f32 %v2659_v33 }
 0x37c   : > { %4619 = vrcp.f32 %v2665_v30 }
 0x37e   : > { %v2671_v35 = vpop.xlane.xlu0 %2670 }
 0x37f   : > { %v2662_v37 = vpop.xlane.xlu1 %2661 }
 0x380   : > { %4621 = vrcp.f32 %v2662_v37 }
 0x381   : > { %4623 = vrcp.f32 %v2680_v34 }
 0x382   : > { %4625 = vrcp.f32 %v2671_v35 }
 0x383   : > { %4627 = vrcp.f32 %v2677_v31  ;;  %v2674_v40 = vpop.xlane.xlu1 %2673 }
 0x384   : > { %4629 = vrcp.f32 %v2674_v40  ;;  %v4616_v41 = vpop.eup %4615 }
 0x385   : > { %v2724_v51 = vmul.f32 %v4616_v41, %v5353_v39 }
 0x388   : > { %v4618_v46 = vpop.eup %4617 }
 0x389   : > { %v4620_v47 = vpop.eup %4619  ;;  %v2721_v54 = vmul.f32 %v4618_v46, %v5359_v44  ;;  %v4573_v44 = vld [vmem:[#allocation4 + $0x20] sm:$0xff]  }
 0x38a   : > { %v2723_v57 = vmul.f32 %v4620_v47, %v5347_v36  ;;  %v4580_v46 = vld [vmem:[%s5547_s9 + $0x20] sm:$0xff]  }
 0x38c   : > { %v2738_v2 = vpack.c.bf16 %v2724_v51, %v2723_v57 }
 0x38d   : > { %v4622_v50 = vpop.eup %4621 }
 0x38e   : > { %v4624_v52 = vpop.eup %4623  ;;  %v2722_v55 = vmul.f32 %v4622_v50, %v5369_v49 }
 0x38f   : > { %v4626_v56 = vpop.eup %4625  ;;  %v2728_v3 = vmul.f32 %v4624_v52, %v5361_v45  ;;  %v4582_v52 = vld [vmem:[%s5547_s9 + $0x30] sm:$0xff]  }
 0x390   : > { %v4628_v58 = vpop.eup %4627  ;;  %v2737_v59 = vpack.c.bf16 %v2722_v55, %v2721_v54  ;;  %v2725_v7 = vmul.f32 %v4626_v56, %v5367_v48 }
 0x391   : > { %v4630_v62 = vpop.eup %4629  ;;  %v2727_v49 = vmul.f32 %v4628_v58, %v5351_v38 }
 0x392   : > { %4330 = vmatprep.mubr.msk.bf16.mxu0 %vm2256_vm1, %v2737_v59  ;;  %v2689_v6 = vpop.xlane.xlu0 %2688  ;;  %v2726_v39 = vmul.f32 %v4630_v62, %v5375_v53 }
 0x393   : > { %4331 = vmatmul.mubr.msk.bf16.vlgmr.msra.gmra.mxu0 %vm2256_vm1, %v2738_v2  ;;  %v2740_v60 = vpack.c.bf16 %v2728_v3, %v2727_v49 }
 0x394   : > { %4343 = vmatpush3.bf16.msra.mxu0 %v5301_v42  ;;  %v2739_v36 = vpack.c.bf16 %v2726_v39, %v2725_v7 }
 0x395   : > { %4344 = vmatprep.subr.bf16.mxu0 %v4573_v44 }
 0x396   : > { %4338 = vmatprep.mubr.msk.bf16.mxu1 %vm2256_vm1, %v2739_v36  ;;  %v2683_v45 = vpop.xlane.xlu0 %2682 }
 0x397   : > { %4339 = vmatmul.mubr.msk.bf16.vlgmr.msra.gmra.mxu1 %vm2256_vm1, %v2740_v60  ;;  %v2692_v10 = vpop.xlane.xlu1 %2691 }
 0x398   : > { %4345 = vmatpush3.bf16.msra.mxu0 %v4573_v44  ;;  %4351 = vmatpush3.bf16.msra.mxu1 %v5303_v43  ;;  %4631 = vrcp.f32 %v2692_v10 }
 0x399   : > { %4352 = vmatprep.subr.bf16.mxu1 %v4574_v8  ;;  %4633 = vrcp.f32 %v2683_v45 }
 0x39a   : > { %v2695_v48 = vpop.xlane.xlu0 %2694  ;;  %4635 = vrcp.f32 %v2689_v6 }
 0x39b   : > { %v2686_v38 = vpop.xlane.xlu1 %2685 }
 0x39c   : > { %4353 = vmatpush3.bf16.msra.mxu1 %v4574_v8  ;;  %4637 = vrcp.f32 %v2686_v38 }
 0x39d   : > { %4639 = vrcp.f32 %v2695_v48 }
 0x39e   : > { %v2701_v42 = vpop.xlane.xlu0 %2700 }
 0x39f   : > { %v2698_v53 = vpop.xlane.xlu1 %2697 }
 0x3a0   : > { %4641 = vrcp.f32 %v2698_v53 }
 0x3a1   : > { %4643 = vrcp.f32 %v2701_v42 }
 0x3a3   : > { %v2704_v11 = vpop.xlane.xlu1 %2703 }
 0x3a4   : > { %4645 = vrcp.f32 %v2704_v11 }
 0x3a5   : > { %v4632_v12 = vpop.eup %4631 }
 0x3a6   : > { %v4634_v13 = vpop.eup %4633  ;;  %v2732_v43 = vmul.f32 %v4632_v12, %v5393_v61 }
 0x3a7   : > { %v4636_v63 = vpop.eup %4635  ;;  %v2729_v14 = vmul.f32 %v4634_v13, %v5391_v19 }
 0x3a8   : > { %v2731_v17 = vmul.f32 %v4636_v63, %v5387_v0 }
 0x3a9   : > { %v4638_v1 = vpop.eup %4637 }
 0x3aa   : > { %v2730_v15 = vmul.f32 %v4638_v1, %v5401_v21  ;;  %v4640_v16 = vpop.eup %4639  ;;  %v2742_v9 = vpack.c.bf16 %v2732_v43, %v2731_v17  ;;  %v3828_v1 = vld [vmem:[%s5548_s10] ss:$0 sm:$0xff] }
 0x3ab   : > { %v2733_v4 = vmul.f32 %v4640_v16, %v5399_v20  ;;  %v4575_v20 = vld [vmem:[%s5547_s9 + $0x8] sm:$0xff]  }
 0x3ac   : > { %v2741_v5 = vpack.c.bf16 %v2730_v15, %v2729_v14  ;;  %4358 = vmatprep.subr.bf16.mxu0 %v4575_v20 }
 0x3ad   : > { %v4642_v18 = vpop.eup %4641 }
 0x3ae   : > { %4346 = vmatprep.mubr.msk.bf16.mxu0 %vm2256_vm1, %v2741_v5  ;;  %v2734_v22 = vmul.f32 %v4642_v18, %v5409_v25  ;;  %v4644_v23 = vpop.eup %4643  ;;  %v4576_v25 = vld [vmem:[%s5547_s9] sm:$0xff]  }
 0x3af   : > { %4347 = vmatmul.mubr.msk.bf16.vlgmr.msra.gmra.mxu0 %vm2256_vm1, %v2742_v9  ;;  %v2735_v19 = vmul.f32 %v4644_v23, %v5407_v24  ;;  %v4577_v24 = vld [vmem:[%s5547_s9 + $0x18] sm:$0xff]  }
 0x3b0   : > { %v2743_v61 = vpack.c.bf16 %v2734_v22, %v2733_v4  ;;  %4359 = vmatpush3.bf16.msra.mxu0 %v4575_v20  ;;  %4366 = vmatprep.subr.bf16.mxu1 %v4577_v24 }
 0x3b1   : > { %v4646_v26 = vpop.eup %4645  ;;  %4360 = vmatprep.subr.bf16.mxu0 %v4576_v25 }
 0x3b2   : > { %v2736_v21 = vmul.f32 %v4646_v26, %v5415_v28  ;;  %4354 = vmatprep.mubr.msk.bf16.mxu1 %vm2256_vm1, %v2743_v61  ;;  %v4579_v28 = vld [vmem:[%s5547_s9 + $0x28] sm:$0xff]  }
 0x3b4   : > { %v2744_v0 = vpack.c.bf16 %v2736_v21, %v2735_v19  ;;  %4361 = vmatpush3.bf16.msra.mxu0 %v4576_v25 }
 0x3b5   : > { %4374 = vmatprep.subr.bf16.mxu0 %v4579_v28 }
 0x3b6   : > { %4355 = vmatmul.mubr.msk.bf16.vlgmr.msra.gmra.mxu1 %vm2256_vm1, %v2744_v0 }
 0x3b7   : > { %4367 = vmatpush3.bf16.msra.mxu1 %v4577_v24 }
 0x3b8   : > { %4368 = vmatprep.subr.bf16.mxu1 %v4578_v27 }
 0x3bb   : > { %4369 = vmatpush3.bf16.msra.mxu1 %v4578_v27 }
 0x3bc   : > { %4382 = vmatprep.subr.bf16.mxu1 %v4581_v29 }
 0x453   : > { %v4332_v30 = vpop.f32.mrf.mxu0 }
 0x455   : > { %v2797_v31 = vpop.f32.mrf.mxu0 }
 0x457   : > { %v4333_v32 = vpop.f32.mrf.mxu0  ;;  %v4340_v33 = vpop.f32.mrf.mxu1 }
 0x458   : > { %v3014_v40 = vpack.c.bf16 %v4333_v32, %v4332_v30 }
 0x459   : > { %v2800_v34 = vpop.f32.mrf.mxu0  ;;  %v2864_v35 = vpop.f32.mrf.mxu1 }
 0x45a   : > { %v3013_v37 = vpack.c.bf16 %v2800_v34, %v2797_v31 }
 0x45b   : > { %v4341_v41 = vpop.f32.mrf.mxu1 }
 0x45c   : > { %4362 = vmatprep.mubr.msk.bf16.mxu0 %vm2256_vm1, %v3013_v37  ;;  %v3016_v51 = vpack.c.bf16 %v4341_v41, %v4340_v33 }
 0x45d   : > { %v2867_v47 = vpop.f32.mrf.mxu1  ;;  %4363 = vmatmul.mubr.msk.bf16.vlgmr.msra.gmra.mxu0 %vm2256_vm1, %v3014_v40 }
 0x45e   : > { %v3015_v50 = vpack.c.bf16 %v2867_v47, %v2864_v35  ;;  %4375 = vmatpush3.bf16.msra.mxu0 %v4579_v28 }
 0x45f   : > { %4376 = vmatprep.subr.bf16.mxu0 %v4580_v46 }
 0x460   : > { %4370 = vmatprep.mubr.msk.bf16.mxu1 %vm2256_vm1, %v3015_v50 }
 0x461   : > { %4371 = vmatmul.mubr.msk.bf16.vlgmr.msra.gmra.mxu1 %vm2256_vm1, %v3016_v51 }
 0x462   : > { %4377 = vmatpush3.bf16.msra.mxu0 %v4580_v46  ;;  %4383 = vmatpush3.bf16.msra.mxu1 %v4581_v29 }
 0x463   : > { %4384 = vmatprep.subr.bf16.mxu1 %v4582_v52 }
 0x466   : > { %4385 = vmatpush3.bf16.msra.mxu1 %v4582_v52 }
 0x46f   : > { %v4348_v54 = vpop.f32.mrf.mxu0 }
 0x471   : > { %v2931_v55 = vpop.f32.mrf.mxu0 }
 0x473   : > { %v4349_v56 = vpop.f32.mrf.mxu0 }
 0x474   : > { %v3018_v62 = vpack.c.bf16 %v4349_v56, %v4348_v54 }
 0x475   : > { %v2934_v57 = vpop.f32.mrf.mxu0 }
 0x476   : > { %v3017_v58 = vpack.c.bf16 %v2934_v57, %v2931_v55  ;;  %v4356_v59 = vpop.f32.mrf.mxu1 }
 0x478   : > { %v2998_v2 = vpop.f32.mrf.mxu1  ;;  %4378 = vmatprep.mubr.msk.bf16.mxu0 %vm2256_vm1, %v3017_v58 }
 0x479   : > { %4379 = vmatmul.mubr.msk.bf16.vlgmr.msra.gmra.mxu0 %vm2256_vm1, %v3018_v62 }
 0x47a   : > { %v4357_v3 = vpop.f32.mrf.mxu1 }
 0x47b   : > { %v3020_v39 = vpack.c.bf16 %v4357_v3, %v4356_v59 }
 0x47c   : > { %v3001_v6 = vpop.f32.mrf.mxu1 }
 0x47d   : > { %v3019_v7 = vpack.c.bf16 %v3001_v6, %v2998_v2 }
 0x47f   : > { %4386 = vmatprep.mubr.msk.bf16.mxu1 %vm2256_vm1, %v3019_v7 }
 0x480   : > { %4387 = vmatmul.mubr.msk.bf16.vlgmr.msra.gmra.mxu1 %vm2256_vm1, %v3020_v39 }
 0x51d   : > { %v4364_v44 = vpop.f32.mrf.mxu0 }
 0x51f   : > { %v3089_v49 = vpop.f32.mrf.mxu0 }
 0x521   : > { %v4372_v36 = vpop.f32.mrf.mxu1  ;;  %v4365_v60 = vpop.f32.mrf.mxu0 }
 0x522   : > { %v3311_v42 = vadd.f32 %v4372_v36, %v4364_v44 }
 0x523   : > { %v3156_v45 = vpop.f32.mrf.mxu1  ;;  %v3092_v10 = vpop.f32.mrf.mxu0 }
 0x524   : > { %v3305_v12 = vadd.f32 %v3156_v45, %v3089_v49 }
 0x525   : > { %v4373_v48 = vpop.f32.mrf.mxu1 }
 0x526   : > { %v3314_v43 = vadd.f32 %v4373_v48, %v4365_v60 }
 0x527   : > { %v3159_v53 = vpop.f32.mrf.mxu1 }
 0x528   : > { %v3308_v5 = vadd.f32 %v3159_v53, %v3092_v10 }
 0x539   : > { %v4380_v8 = vpop.f32.mrf.mxu0 }
 0x53a   : > { %v3312_v13 = vadd.f32 %v4380_v8, %v3311_v42 }
 0x53b   : > { %v3223_v38 = vpop.f32.mrf.mxu0 }
 0x53c   : > { %v3306_v14 = vadd.f32 %v3305_v12, %v3223_v38 }
 0x53d   : > { %v4381_v11 = vpop.f32.mrf.mxu0 }
 0x53e   : > { %v3315_v18 = vadd.f32 %v4381_v11, %v3314_v43 }
 0x53f   : > { %v3226_v16 = vpop.f32.mrf.mxu0 }
 0x540   : > { %v4388_v63 = vpop.f32.mrf.mxu1  ;;  %v3309_v23 = vadd.f32 %v3308_v5, %v3226_v16 }
 0x541   : > { %v3313_v15 = vadd.f32 %v4388_v63, %v3312_v13 }
 0x542   : > { %v3290_v17 = vpop.f32.mrf.mxu1 }
 0x543   : > { %v3326_v9 = vadd.f32 %v3828_v1, %v3313_v15  ;;  %v3307_v4 = vadd.f32 %v3306_v14, %v3290_v17 }
 0x544   : > { %v4389_v22 = vpop.f32.mrf.mxu1 }
 0x545   : > { %3330 = vst [vmem:[%s434_s16 + $0x10] sm:$0xff] %v3326_v9  ;;  %v3324_v61 = vadd.f32 %v3828_v1, %v3307_v4  ;;  %v3316_v26 = vadd.f32 %v4389_v22, %v3315_v18 }
 0x546   : > { %v3293_v19 = vpop.f32.mrf.mxu1 }
 0x547   : > { %3328 = vst [vmem:[%s434_s16] sm:$0xff] %v3324_v61  ;;  %v3327_v21 = vadd.f32 %v3828_v1, %v3316_v26  ;;  %v3310_v0 = vadd.f32 %v3309_v23, %v3293_v19 }
 0x549   : > { %3331 = vst [vmem:[%s434_s16 + $0x18] sm:$0xff] %v3327_v21  ;;  %v3325_v20 = vadd.f32 %v3828_v1, %v3310_v0 }
 0x54b   : > { %3329 = vst [vmem:[%s434_s16 + $0x8] sm:$0xff] %v3325_v20 }
 0x54c   : > { %4660 = shalt.err (!%p4657_p5)
}
 0x54d   : > { %s4661_s21 = scalar_lea.hbm %s5489_s24, 512  ;;  %s4665_s28 = scalar_lea.hbm %s5549_s11, 1024 }
 0x54e   : > { %p4662_p6 = scmp.ne.s32.totalorder %s5489_s24, %s4661_s21  ;;  %p4666_p10 = scmp.lt.s32.totalorder %s5489_s24, %s5549_s11 }
 0x54f   : > { %p4667_p11 = scmp.lt.s32.totalorder %s4665_s28, %s4661_s21 }
 0x550   : > { %p4663_p7 = pnand %p4662_p6, %p4828_p4 }
 0x551   : > { %p4668_p12 = por %p4667_p11, %p4666_p10 }
 0x552   : > { %p4664_p9 = pneg %p4663_p7 }
 0x554   : > { %p4669_p13 = pnand %p4668_p12, %p4664_p9 }
 0x556   : > { %4672 = shalt.err (!%p4669_p13)
}
 0x557   : > { %s4726_s20 = smov 128   ;;  %s4727_s14 = smov 8  }
 0x558   : > { %4398 = dma.vmem_to_hbm [thread:$0]  (%p4828_p4), %s5484_s23, 512, %s5489_s24, %s5493_s12, %s4726_s20, %s4726_s20, %s4727_s14  }
 0x559 PF: > { %p4404_p0 = scmp.ge.s32.totalorder %s4723_s22, 2  ;;  %s3363_s25 = sand.u32 1, %s4703_s17  }
 0x55a   : > { %s3364_s21 = scalar_lea.sflag [#allocation6], %s3363_s25 }
 0x55b   : > { %p4401_p1 = pnand %p4404_p0, %p4835_p8 }
 0x55d   : > { %p4402_p2 = pneg %p4401_p1 }
 0x55f   : > { %4698 = dma.done.wait (%p4402_p2), %s3364_s21, 512  }
 0x560   : > { %4700 = vsyncadd (%p4402_p2), %s3364_s21, 4294966784  ;;  %s24_s22 = sadd.s32 1, %s4723_s22   ;;  %s5556_s20 = sld [smem:[#allocation8_spill]] }
 0x561   : > { %p21_p3 = scmp.ge.s32.totalorder %s24_s22, 4   ;;  %s5557_s21 = sld [smem:[#allocation9_spill]] }
 0x562   : > { %s5558_s17 = smov %s4707_s18  ;;  %s5559_s18 = smov %s4711_s19 }
 0x563   : > { %s5560_s19 = smov %s4841_s30  ;;  %23 = sbr.rel (!%p21_p3) target bundleno = 4 (0x4), region = 136 }
 0x568   :  { %3369 = vsyncpa [#allocation6], 1 }
 0x569   :  { %3371 = vsyncpa [#allocation6 + $0x1], 1 }

</bundles_post_ra>
